<compile_context>
chip_gen: v5e
topology: v5e:2x2
jax: 0.10.0
libtpu: 0.0.40
codegen_flags: <defaults>
</compile_context>

<pallas_src>
import functools
import math

import jax
import jax.numpy as jnp
from jax.experimental import pallas as pl
from jax.experimental.pallas import tpu as pltpu


def attn_block_kernel(x_ref, member_ref, gamma_ref, beta_ref,
                      wqkv_ref, bqkv_ref, wp_ref, bp_ref,
                      o_ref, q_scr, k_scr, v_scr, *, eps, tq):
    qi = pl.program_id(1)
    S, C = x_ref.shape
    G = member_ref.shape[1]
    cg = C // G

    # ---- once per batch element: GroupNorm + fused q/k/v projection ----
    @pl.when(qi == 0)
    def _():
        x = x_ref[...]                                      # (S, C) f32
        member = member_ref[...]                            # (C, G) one-hot f32
        inv_n = 1.0 / (S * cg)
        # one-pass stats: sum and sum-of-squares grouped with one matmul
        s1 = jnp.sum(x, axis=0, keepdims=True)              # (1, C)
        s2 = jnp.sum(x * x, axis=0, keepdims=True)          # (1, C)
        stats = jnp.concatenate([s1, s2], axis=0)           # (2, C)
        g = jnp.dot(stats, member,
                    preferred_element_type=jnp.float32) * inv_n        # (2, G)
        gc = jax.lax.dot_general(g, member, (((1,), (1,)), ((), ())),
                                 preferred_element_type=jnp.float32)   # (2, C)
        mean_c = gc[0:1, :]
        var_c = jnp.maximum(gc[1:2, :] - mean_c * mean_c, 0.0)   # clamp >= 0
        h = (x - mean_c) * jax.lax.rsqrt(var_c + eps)
        h = h * gamma_ref[...] + beta_ref[...]               # (S, C) f32
        # fused q/k/v projection (bf16 MXU operands, f32 accumulation)
        qkv = jnp.dot(h.astype(jnp.bfloat16), wqkv_ref[...],
                      preferred_element_type=jnp.float32) + bqkv_ref[...]
        q_scr[...] = qkv[:, :C].astype(jnp.bfloat16)          # C**-0.5 pre-folded
        k_scr[...] = qkv[:, C:2 * C].astype(jnp.bfloat16)
        v_scr[...] = qkv[:, 2 * C:].astype(jnp.bfloat16)

    # ---- per query tile: attention + output projection + residual ----
    row0 = pl.multiple_of(qi * tq, tq)
    q = q_scr[pl.ds(row0, tq), :]                             # (tq, C) bf16
    logits = jax.lax.dot_general(q, k_scr[...], (((1,), (1,)), ((), ())),
                                 preferred_element_type=jnp.float32)   # (tq, S)
    logits = logits - jnp.max(logits, axis=-1, keepdims=True)
    p = jnp.exp(logits)
    inv = pl.reciprocal(jnp.sum(p, axis=-1, keepdims=True), approx=True)
    p = (p * inv).astype(jnp.bfloat16)
    a = jnp.dot(p, v_scr[...], preferred_element_type=jnp.float32)     # (tq, C)
    out = jnp.dot(a.astype(jnp.bfloat16), wp_ref[...],
                  preferred_element_type=jnp.float32) + bp_ref[...]
    o_ref[...] = x_ref[pl.ds(row0, tq), :] + out              # residual in f32


def _vmem_limit_bytes():
    try:
        kind = jax.devices()[0].device_kind.lower()
    except Exception:
        kind = ""
    if "v7" in kind:
        return 48 * 1024 * 1024      # 64 MiB physical -> leave headroom
    if "v6" in kind or "v5" in kind:
        return 96 * 1024 * 1024      # 128 MiB physical
    return None                      # keep compiler default on other chips


def attn_block_forward_nhwc(x_nhwc, gamma, beta, wq, bq, wk, bk, wv, bv, wp, bp,
                            *, num_groups=32, eps=1e-5, tq=128):
    """x_nhwc: (B, H, W, C) f32.  gamma/beta/b*: (1, C).  w*: (C_in, C_out)
    (= torch conv weight[:, :, 0, 0].T)."""
    B, H, W, C = x_nhwc.shape
    G = num_groups
    assert C % G == 0, "GroupNorm(32, C) requires C % 32 == 0"
    # TODO(synk): pad C to a multiple of 128 (zero-padded member/weights/affine)
    # for lane-dense stores and full MXU width when the model config needs it.
    S = H * W
    tq = min(tq, S)
    assert S % tq == 0, "H*W must be divisible by the query tile size"

    xf = x_nhwc.reshape(B, S, C)
    scale = float(C) ** -0.5
    # fold the attention scale into the q projection; pack fused q/k/v weights
    wqkv = jnp.concatenate([wq * scale, wk, wv], axis=1).astype(jnp.bfloat16)
    bqkv = jnp.concatenate([bq * scale, bk, bv], axis=1).astype(jnp.float32)
    wp16 = wp.astype(jnp.bfloat16)
    member = (jnp.arange(C)[:, None] // (C // G)
              == jnp.arange(G)[None, :]).astype(jnp.float32)   # (C, G)

    kernel = functools.partial(attn_block_kernel, eps=eps, tq=tq)

    # grid-invariant operands: constant index_map keeps them VMEM-resident
    # (no re-DMA across grid steps).
    def const(shape):
        return pl.BlockSpec(shape, lambda b, qi: (0,) * len(shape))

    out_flat = pl.pallas_call(
        kernel,
        out_shape=jax.ShapeDtypeStruct((B, S, C), jnp.float32),
        grid=(B, S // tq),
        in_specs=[
            pl.BlockSpec((None, S, C), lambda b, qi: (b, 0, 0)),  # x (per batch)
            const((C, G)),         # group membership
            const((1, C)),         # gamma
            const((1, C)),         # beta
            const((C, 3 * C)),     # fused wq|wk|wv (bf16)
            const((1, 3 * C)),     # fused bq|bk|bv (f32)
            const((C, C)),         # wp (bf16)
            const((1, C)),         # bp (f32)
        ],
        out_specs=pl.BlockSpec((None, tq, C), lambda b, qi: (b, qi, 0)),
        scratch_shapes=[
            pltpu.VMEM((S, C), jnp.bfloat16),   # q (scale already folded in)
            pltpu.VMEM((S, C), jnp.bfloat16),   # k
            pltpu.VMEM((S, C), jnp.bfloat16),   # v
        ],
        compiler_params=pltpu.CompilerParams(
            # batch axis is parallel (shards across TCs on multi-core chips);
            # the query-tile axis must stay "arbitrary" because the q/k/v
            # scratch is filled at qi == 0 and reused by later tiles.
            dimension_semantics=("parallel", "arbitrary"),
            vmem_limit_bytes=_vmem_limit_bytes(),
        ),
    )(xf, member, gamma, beta, wqkv, bqkv, wp16, bp)
    return out_flat.reshape(B, H, W, C)


def attn_block_forward(x, *params, num_groups=32, eps=1e-5, tq=128):
    """NCHW entry matching the PyTorch module.  An NHWC model should call
    attn_block_forward_nhwc directly and skip these two transposes (each is a
    full HBM read+write of the activation)."""
    x_nhwc = jnp.transpose(x, (0, 2, 3, 1))
    out = attn_block_forward_nhwc(x_nhwc, *params, num_groups=num_groups,
                                  eps=eps, tq=tq)
    return jnp.transpose(out, (0, 3, 1, 2))


def init_params(key, C):
    """Xavier-uniform 1x1-conv weights stored as (C_in, C_out); small random
    biases / affine params so every code path is numerically exercised.
    (The torch module zero-inits biases and uses gain=1e-5 on proj; forward
    semantics are identical for any parameter values.)"""
    ks = jax.random.split(key, 10)
    bound = math.sqrt(6.0 / (C + C))
    wq = jax.random.uniform(ks[0], (C, C), jnp.float32, -bound, bound)
    wk = jax.random.uniform(ks[1], (C, C), jnp.float32, -bound, bound)
    wv = jax.random.uniform(ks[2], (C, C), jnp.float32, -bound, bound)
    wp = jax.random.uniform(ks[3], (C, C), jnp.float32, -bound, bound)
    bq = 0.1 * jax.random.normal(ks[4], (1, C), jnp.float32)
    bk = 0.1 * jax.random.normal(ks[5], (1, C), jnp.float32)
    bv = 0.1 * jax.random.normal(ks[6], (1, C), jnp.float32)
    bp = 0.1 * jax.random.normal(ks[7], (1, C), jnp.float32)
    gamma = 1.0 + 0.1 * jax.random.normal(ks[8], (1, C), jnp.float32)
    beta = 0.1 * jax.random.normal(ks[9], (1, C), jnp.float32)
    return gamma, beta, wq, bq, wk, bk, wv, bv, wp, bp


def reference_forward(x, gamma, beta, wq, bq, wk, bk, wv, bv, wp, bp,
                      *, num_groups=32, eps=1e-5):
    B, C, H, W = x.shape
    G = num_groups
    xg = x.reshape(B, G, C // G, H, W)
    mean = jnp.mean(xg, axis=(2, 3, 4), keepdims=True)
    var = jnp.mean((xg - mean) ** 2, axis=(2, 3, 4), keepdims=True)
    h = ((xg - mean) / jnp.sqrt(var + eps)).reshape(B, C, H, W)
    h = h * gamma.reshape(1, C, 1, 1) + beta.reshape(1, C, 1, 1)

    hf = h.transpose(0, 2, 3, 1).reshape(B, H * W, C)
    hp = jax.lax.Precision.HIGHEST
    q = jnp.einsum('bsc,cd->bsd', hf, wq, precision=hp) + bq
    k = jnp.einsum('bsc,cd->bsd', hf, wk, precision=hp) + bk
    v = jnp.einsum('bsc,cd->bsd', hf, wv, precision=hp) + bv
    w = jnp.einsum('bic,bjc->bij', q, k, precision=hp) * (int(C) ** -0.5)
    w = jax.nn.softmax(w, axis=-1)
    a = jnp.einsum('bij,bjc->bic', w, v, precision=hp)
    out = jnp.einsum('bsc,cd->bsd', a, wp, precision=hp) + bp
    out = out.reshape(B, H, W, C).transpose(0, 3, 1, 2)
    return x + out


if __name__ == "__main__":
    # GroupNorm(32, C) requires C % 32 == 0; C=128 also keeps the lane axis
    # dense and the MXU full.  S = 16*16 = 256 exercises the query tiling
    # (two tq=128 tiles per batch element).
    B, C, H, W = 2, 128, 16, 16

    key = jax.random.PRNGKey(0)
    kx, kp = jax.random.split(key)
    x = jax.random.normal(kx, (B, C, H, W), jnp.float32)
    params = init_params(kp, C)

    out = attn_block_forward(x, *params)
    out = jax.block_until_ready(out)

    ref = reference_forward(x, *params)
    assert out.shape == (B, C, H, W)
    max_err = float(jnp.max(jnp.abs(out - ref)))
    # bf16 MXU operands + approx reciprocal -> looser tolerance than full f32.
    assert jnp.allclose(out, ref, atol=5e-2, rtol=5e-2), (
        f"mismatch vs pure-JAX reference (max abs err {max_err})")

    print("KERNEL_OK")
</pallas_src>

<mosaic_0001>
module attributes {stable_mosaic.version = 11 : i64} {
  func.func @attn_block_kernel(%arg0: i32, %arg1: i32, %arg2: memref<1x256x128xf32, #tpu.memory_space<vmem>>, %arg3: memref<128x32xf32, #tpu.memory_space<vmem>>, %arg4: memref<1x128xf32, #tpu.memory_space<vmem>>, %arg5: memref<1x128xf32, #tpu.memory_space<vmem>>, %arg6: memref<128x384xbf16, #tpu.memory_space<vmem>>, %arg7: memref<1x384xf32, #tpu.memory_space<vmem>>, %arg8: memref<128x128xbf16, #tpu.memory_space<vmem>>, %arg9: memref<1x128xf32, #tpu.memory_space<vmem>>, %arg10: memref<1x128x128xf32, #tpu.memory_space<vmem>>, %arg11: memref<256x128xbf16, #tpu.memory_space<vmem>>, %arg12: memref<256x128xbf16, #tpu.memory_space<vmem>>, %arg13: memref<256x128xbf16, #tpu.memory_space<vmem>>) attributes {dimension_semantics = [#tpu.dimension_semantics<parallel>, #tpu.dimension_semantics<arbitrary>], iteration_bounds = array<i64: 2, 2>, scalar_prefetch = 0 : i64, scratch_operands = 3 : i64, tpu.core_type = #tpu.core_type<tc>, window_params = [{transform_indices = @transform_0, window_bounds = array<i64: 1, 256, 128>}, {pipeline_mode = #tpu.pipeline_mode<synchronous>, transform_indices = @transform_1, window_bounds = array<i64: 128, 32>}, {pipeline_mode = #tpu.pipeline_mode<synchronous>, transform_indices = @transform_2, window_bounds = array<i64: 1, 128>}, {pipeline_mode = #tpu.pipeline_mode<synchronous>, transform_indices = @transform_3, window_bounds = array<i64: 1, 128>}, {pipeline_mode = #tpu.pipeline_mode<synchronous>, transform_indices = @transform_4, window_bounds = array<i64: 128, 384>}, {pipeline_mode = #tpu.pipeline_mode<synchronous>, transform_indices = @transform_5, window_bounds = array<i64: 1, 384>}, {pipeline_mode = #tpu.pipeline_mode<synchronous>, transform_indices = @transform_6, window_bounds = array<i64: 128, 128>}, {pipeline_mode = #tpu.pipeline_mode<synchronous>, transform_indices = @transform_7, window_bounds = array<i64: 1, 128>}, {transform_indices = @transform_8, window_bounds = array<i64: 1, 128, 128>}]} {
    %c0_i32 = arith.constant 0 : i32
    %0 = arith.cmpi eq, %arg1, %c0_i32 : i32
    %1 = arith.extui %0 : i1 to i32
    %c0_i32_0 = arith.constant 0 : i32
    %2 = arith.cmpi ne, %1, %c0_i32_0 : i32
    scf.if %2 {
      %c0_18 = arith.constant 0 : index
      %c0_19 = arith.constant 0 : index
      %c0_20 = arith.constant 0 : index
      %35 = vector.load %arg2[%c0_18, %c0_19, %c0_20] : memref<1x256x128xf32, #tpu.memory_space<vmem>>, vector<1x256x128xf32>
      %36 = vector.shape_cast %35 : vector<1x256x128xf32> to vector<256x128xf32>
      %c0_21 = arith.constant 0 : index
      %c0_22 = arith.constant 0 : index
      %37 = vector.load %arg3[%c0_21, %c0_22] : memref<128x32xf32, #tpu.memory_space<vmem>>, vector<128x32xf32>
      %cst_23 = arith.constant dense<0.000000e+00> : vector<128xf32>
      %38 = vector.multi_reduction <add>, %36, %cst_23 [0] : vector<256x128xf32> to vector<128xf32>
      %39 = vector.shape_cast %38 : vector<128xf32> to vector<1x128xf32>
      %40 = arith.mulf %36, %36 : vector<256x128xf32>
      %cst_24 = arith.constant dense<0.000000e+00> : vector<128xf32>
      %41 = vector.multi_reduction <add>, %40, %cst_24 [0] : vector<256x128xf32> to vector<128xf32>
      %42 = vector.shape_cast %41 : vector<128xf32> to vector<1x128xf32>
      %43 = tpu.concatenate %39, %42 in 0 : vector<1x128xf32>, vector<1x128xf32> -> vector<2x128xf32>
      %cst_25 = arith.constant dense<0.000000e+00> : vector<2x32xf32>
      %44 = tpu.matmul %43, %37, %cst_25 {dimension_numbers = #tpu.dot_dimension_numbers<[1], [0], [0], [1], [0, 0, 1, 1], [], []>} : vector<2x128xf32>, vector<128x32xf32>, vector<2x32xf32> -> vector<2x32xf32>
      %cst_26 = arith.constant 9.765625E-4 : f32
      %45 = vector.broadcast %cst_26 : f32 to vector<2x32xf32>
      %46 = arith.mulf %44, %45 : vector<2x32xf32>
      %cst_27 = arith.constant dense<0.000000e+00> : vector<2x128xf32>
      %47 = tpu.matmul %46, %37, %cst_27 {dimension_numbers = #tpu.dot_dimension_numbers<[1], [1], [0], [0], [0, 0, 1, 0], [], []>} : vector<2x32xf32>, vector<128x32xf32>, vector<2x128xf32> -> vector<2x128xf32>
      %48 = vector.extract_strided_slice %47 {offsets = [0, 0], sizes = [1, 128], strides = [1, 1]} : vector<2x128xf32> to vector<1x128xf32>
      %49 = vector.extract_strided_slice %47 {offsets = [1, 0], sizes = [1, 128], strides = [1, 1]} : vector<2x128xf32> to vector<1x128xf32>
      %50 = arith.mulf %48, %48 : vector<1x128xf32>
      %51 = arith.subf %49, %50 : vector<1x128xf32>
      %cst_28 = arith.constant 0.000000e+00 : f32
      %52 = vector.broadcast %cst_28 : f32 to vector<1x128xf32>
      %53 = arith.maximumf %51, %52 : vector<1x128xf32>
      %54 = vector.broadcast %48 : vector<1x128xf32> to vector<256x128xf32>
      %55 = arith.subf %36, %54 : vector<256x128xf32>
      %cst_29 = arith.constant 9.99999974E-6 : f32
      %56 = vector.broadcast %cst_29 : f32 to vector<1x128xf32>
      %57 = arith.addf %53, %56 : vector<1x128xf32>
      %58 = math.rsqrt %57 : vector<1x128xf32>
      %59 = vector.broadcast %58 : vector<1x128xf32> to vector<256x128xf32>
      %60 = arith.mulf %55, %59 : vector<256x128xf32>
      %c0_30 = arith.constant 0 : index
      %c0_31 = arith.constant 0 : index
      %61 = vector.load %arg4[%c0_30, %c0_31] : memref<1x128xf32, #tpu.memory_space<vmem>>, vector<1x128xf32>
      %62 = vector.broadcast %61 : vector<1x128xf32> to vector<256x128xf32>
      %63 = arith.mulf %60, %62 : vector<256x128xf32>
      %c0_32 = arith.constant 0 : index
      %c0_33 = arith.constant 0 : index
      %64 = vector.load %arg5[%c0_32, %c0_33] : memref<1x128xf32, #tpu.memory_space<vmem>>, vector<1x128xf32>
      %65 = vector.broadcast %64 : vector<1x128xf32> to vector<256x128xf32>
      %66 = arith.addf %63, %65 : vector<256x128xf32>
      %67 = arith.truncf %66 : vector<256x128xf32> to vector<256x128xbf16>
      %c0_34 = arith.constant 0 : index
      %c0_35 = arith.constant 0 : index
      %68 = vector.load %arg6[%c0_34, %c0_35] : memref<128x384xbf16, #tpu.memory_space<vmem>>, vector<128x384xbf16>
      %cst_36 = arith.constant dense<0.000000e+00> : vector<256x384xf32>
      %69 = tpu.matmul %67, %68, %cst_36 {dimension_numbers = #tpu.dot_dimension_numbers<[1], [0], [0], [1], [0, 0, 1, 1], [], []>} : vector<256x128xbf16>, vector<128x384xbf16>, vector<256x384xf32> -> vector<256x384xf32>
      %c0_37 = arith.constant 0 : index
      %c0_38 = arith.constant 0 : index
      %70 = vector.load %arg7[%c0_37, %c0_38] : memref<1x384xf32, #tpu.memory_space<vmem>>, vector<1x384xf32>
      %71 = vector.broadcast %70 : vector<1x384xf32> to vector<256x384xf32>
      %72 = arith.addf %69, %71 : vector<256x384xf32>
      %73 = vector.extract_strided_slice %72 {offsets = [0, 0], sizes = [256, 128], strides = [1, 1]} : vector<256x384xf32> to vector<256x128xf32>
      %74 = arith.truncf %73 : vector<256x128xf32> to vector<256x128xbf16>
      %c0_39 = arith.constant 0 : index
      %c0_40 = arith.constant 0 : index
      %75 = vector.load %arg11[%c0_39, %c0_40] : memref<256x128xbf16, #tpu.memory_space<vmem>>, vector<256x128xbf16>
      tpu.vector_store %arg11[%c0_39, %c0_40], %74 {strides = array<i32>} : memref<256x128xbf16, #tpu.memory_space<vmem>>, vector<256x128xbf16>,
      %76 = vector.extract_strided_slice %72 {offsets = [0, 128], sizes = [256, 128], strides = [1, 1]} : vector<256x384xf32> to vector<256x128xf32>
      %77 = arith.truncf %76 : vector<256x128xf32> to vector<256x128xbf16>
      %c0_41 = arith.constant 0 : index
      %c0_42 = arith.constant 0 : index
      %78 = vector.load %arg12[%c0_41, %c0_42] : memref<256x128xbf16, #tpu.memory_space<vmem>>, vector<256x128xbf16>
      tpu.vector_store %arg12[%c0_41, %c0_42], %77 {strides = array<i32>} : memref<256x128xbf16, #tpu.memory_space<vmem>>, vector<256x128xbf16>,
      %79 = vector.extract_strided_slice %72 {offsets = [0, 256], sizes = [256, 128], strides = [1, 1]} : vector<256x384xf32> to vector<256x128xf32>
      %80 = arith.truncf %79 : vector<256x128xf32> to vector<256x128xbf16>
      %c0_43 = arith.constant 0 : index
      %c0_44 = arith.constant 0 : index
      %81 = vector.load %arg13[%c0_43, %c0_44] : memref<256x128xbf16, #tpu.memory_space<vmem>>, vector<256x128xbf16>
      tpu.vector_store %arg13[%c0_43, %c0_44], %80 {strides = array<i32>} : memref<256x128xbf16, #tpu.memory_space<vmem>>, vector<256x128xbf16>,
    } else {
    }
    %c128_i32 = arith.constant 128 : i32
    %3 = arith.muli %arg1, %c128_i32 : i32
    %4 = tpu.assume_multiple %3, 128 : i32
    %5 = arith.index_cast %4 : i32 to index
    %c0 = arith.constant 0 : index
    %6 = vector.load %arg11[%5, %c0] : memref<256x128xbf16, #tpu.memory_space<vmem>>, vector<128x128xbf16>
    %c0_1 = arith.constant 0 : index
    %c0_2 = arith.constant 0 : index
    %7 = vector.load %arg12[%c0_1, %c0_2] : memref<256x128xbf16, #tpu.memory_space<vmem>>, vector<256x128xbf16>
    %cst = arith.constant dense<0.000000e+00> : vector<128x256xf32>
    %8 = tpu.matmul %6, %7, %cst {dimension_numbers = #tpu.dot_dimension_numbers<[1], [1], [0], [0], [0, 0, 1, 0], [], []>} : vector<128x128xbf16>, vector<256x128xbf16>, vector<128x256xf32> -> vector<128x256xf32>
    %cst_3 = arith.constant dense<0xFF800000> : vector<128xf32>
    %9 = vector.multi_reduction <maximumf>, %8, %cst_3 [1] : vector<128x256xf32> to vector<128xf32>
    %10 = vector.shape_cast %9 : vector<128xf32> to vector<128x1xf32>
    %11 = vector.broadcast %10 : vector<128x1xf32> to vector<128x256xf32>
    %12 = arith.subf %8, %11 : vector<128x256xf32>
    %13 = math.exp %12 : vector<128x256xf32>
    %cst_4 = arith.constant dense<0.000000e+00> : vector<128xf32>
    %14 = vector.multi_reduction <add>, %13, %cst_4 [1] : vector<128x256xf32> to vector<128xf32>
    %15 = vector.shape_cast %14 : vector<128xf32> to vector<128x1xf32>
    %16 = tpu.reciprocal %15 {approx = true} : vector<128x1xf32> -> vector<128x1xf32>
    %17 = vector.broadcast %16 : vector<128x1xf32> to vector<128x256xf32>
    %18 = arith.mulf %13, %17 : vector<128x256xf32>
    %19 = arith.truncf %18 : vector<128x256xf32> to vector<128x256xbf16>
    %c0_5 = arith.constant 0 : index
    %c0_6 = arith.constant 0 : index
    %20 = vector.load %arg13[%c0_5, %c0_6] : memref<256x128xbf16, #tpu.memory_space<vmem>>, vector<256x128xbf16>
    %cst_7 = arith.constant dense<0.000000e+00> : vector<128x128xf32>
    %21 = tpu.matmul %19, %20, %cst_7 {dimension_numbers = #tpu.dot_dimension_numbers<[1], [0], [0], [1], [0, 0, 1, 1], [], []>} : vector<128x256xbf16>, vector<256x128xbf16>, vector<128x128xf32> -> vector<128x128xf32>
    %22 = arith.truncf %21 : vector<128x128xf32> to vector<128x128xbf16>
    %c0_8 = arith.constant 0 : index
    %c0_9 = arith.constant 0 : index
    %23 = vector.load %arg8[%c0_8, %c0_9] : memref<128x128xbf16, #tpu.memory_space<vmem>>, vector<128x128xbf16>
    %cst_10 = arith.constant dense<0.000000e+00> : vector<128x128xf32>
    %24 = tpu.matmul %22, %23, %cst_10 {dimension_numbers = #tpu.dot_dimension_numbers<[1], [0], [0], [1], [0, 0, 1, 1], [], []>} : vector<128x128xbf16>, vector<128x128xbf16>, vector<128x128xf32> -> vector<128x128xf32>
    %c0_11 = arith.constant 0 : index
    %c0_12 = arith.constant 0 : index
    %25 = vector.load %arg9[%c0_11, %c0_12] : memref<1x128xf32, #tpu.memory_space<vmem>>, vector<1x128xf32>
    %26 = vector.broadcast %25 : vector<1x128xf32> to vector<128x128xf32>
    %27 = arith.addf %24, %26 : vector<128x128xf32>
    %c0_13 = arith.constant 0 : index
    %28 = arith.index_cast %4 : i32 to index
    %c0_14 = arith.constant 0 : index
    %29 = vector.load %arg2[%c0_13, %28, %c0_14] : memref<1x256x128xf32, #tpu.memory_space<vmem>>, vector<1x128x128xf32>
    %30 = vector.shape_cast %29 : vector<1x128x128xf32> to vector<128x128xf32>
    %31 = arith.addf %30, %27 : vector<128x128xf32>
    %c0_15 = arith.constant 0 : index
    %c0_16 = arith.constant 0 : index
    %c0_17 = arith.constant 0 : index
    %32 = vector.load %arg10[%c0_15, %c0_16, %c0_17] : memref<1x128x128xf32, #tpu.memory_space<vmem>>, vector<1x128x128xf32>
    %33 = vector.shape_cast %32 : vector<1x128x128xf32> to vector<128x128xf32>
    %34 = vector.shape_cast %31 : vector<128x128xf32> to vector<1x128x128xf32>
    tpu.vector_store %arg10[%c0_15, %c0_16, %c0_17], %34 {strides = array<i32>} : memref<1x128x128xf32, #tpu.memory_space<vmem>>, vector<1x128x128xf32>,
    return
  }
  func.func @transform_0(%arg0: i32, %arg1: i32) -> (i32, i32, i32) {
    %c0_i32 = arith.constant 0 : i32
    %c0_i32_0 = arith.constant 0 : i32
    %c0_i32_1 = arith.constant 0 : i32
    return %arg0, %c0_i32, %c0_i32_0 : i32, i32, i32
  }
  func.func @transform_1(%arg0: i32, %arg1: i32) -> (i32, i32) {
    %c0_i32 = arith.constant 0 : i32
    %c0_i32_0 = arith.constant 0 : i32
    %c0_i32_1 = arith.constant 0 : i32
    return %c0_i32, %c0_i32_0 : i32, i32
  }
  func.func @transform_2(%arg0: i32, %arg1: i32) -> (i32, i32) {
    %c0_i32 = arith.constant 0 : i32
    %c0_i32_0 = arith.constant 0 : i32
    %c0_i32_1 = arith.constant 0 : i32
    return %c0_i32, %c0_i32_0 : i32, i32
  }
  func.func @transform_3(%arg0: i32, %arg1: i32) -> (i32, i32) {
    %c0_i32 = arith.constant 0 : i32
    %c0_i32_0 = arith.constant 0 : i32
    %c0_i32_1 = arith.constant 0 : i32
    return %c0_i32, %c0_i32_0 : i32, i32
  }
  func.func @transform_4(%arg0: i32, %arg1: i32) -> (i32, i32) {
    %c0_i32 = arith.constant 0 : i32
    %c0_i32_0 = arith.constant 0 : i32
    %c0_i32_1 = arith.constant 0 : i32
    return %c0_i32, %c0_i32_0 : i32, i32
  }
  func.func @transform_5(%arg0: i32, %arg1: i32) -> (i32, i32) {
    %c0_i32 = arith.constant 0 : i32
    %c0_i32_0 = arith.constant 0 : i32
    %c0_i32_1 = arith.constant 0 : i32
    return %c0_i32, %c0_i32_0 : i32, i32
  }
  func.func @transform_6(%arg0: i32, %arg1: i32) -> (i32, i32) {
    %c0_i32 = arith.constant 0 : i32
    %c0_i32_0 = arith.constant 0 : i32
    %c0_i32_1 = arith.constant 0 : i32
    return %c0_i32, %c0_i32_0 : i32, i32
  }
  func.func @transform_7(%arg0: i32, %arg1: i32) -> (i32, i32) {
    %c0_i32 = arith.constant 0 : i32
    %c0_i32_0 = arith.constant 0 : i32
    %c0_i32_1 = arith.constant 0 : i32
    return %c0_i32, %c0_i32_0 : i32, i32
  }
  func.func @transform_8(%arg0: i32, %arg1: i32) -> (i32, i32, i32) {
    %c0_i32 = arith.constant 0 : i32
    %c0_i32_0 = arith.constant 0 : i32
    return %arg0, %arg1, %c0_i32 : i32, i32, i32
  }
}

</mosaic_0001>

<bundles_post_ra>
// kernel: tpu_custom_call.1
= control target key start
LH: loop header
LB: loop body
LE: loop exit
PB: predicated region body
PF: predicated region fallthrough
CT: control target
= control target key end

     0   :  { %s4973_s0 = inlined_call_operand.hbm [shape: f32[2,256,128], index: 0, kind: input, shape index: {}]   ;;  %s4974_s1 = inlined_call_operand.vmem [shape: f32[128,32], index: 1, kind: input, shape index: {}]   ;;  %s4975_s2 = inlined_call_operand.vmem [shape: f32[1,128], index: 2, kind: input, shape index: {}]   ;;  %s4976_s3 = inlined_call_operand.vmem [shape: f32[1,128], index: 3, kind: input, shape index: {}]   ;;  %s4977_s4 = inlined_call_operand.hbm [shape: bf16[128,384], index: 4, kind: input, shape index: {}]   ;;  %s4978_s5 = inlined_call_operand.vmem [shape: f32[1,384], index: 5, kind: input, shape index: {}]   ;;  %s4979_s6 = inlined_call_operand.vmem [shape: bf16[128,128], index: 6, kind: input, shape index: {}]   ;;  %s4980_s7 = inlined_call_operand.vmem [shape: f32[1,128], index: 7, kind: input, shape index: {}]   ;;  %s4981_s8 = inlined_call_operand.hbm [shape: f32[2,256,128], index: 8, kind: output, shape index: {}]  }
   0x1   :  { %4991 = sst [smem:[#allocation21_spill]] %s4976_s3 }
   0x2   :  { %4992 = sst [smem:[#allocation22_spill]] %s4977_s4 }
   0x3   :  { %4993 = sst [smem:[#allocation23_spill]] %s4978_s5 }
   0x4   :  { %4994 = sst [smem:[#allocation24_spill]] %s4979_s6 }
   0x5   :  { %4995 = sst [smem:[#allocation25_spill]] %s4980_s7 }
   0x6   :  { %4996 = sst [smem:[#allocation26_spill]] %s4981_s8 }
   0x7   :  { %13 = vsyncpa [#allocation6], 0 }
   0x8   :  { %15 = vsyncpa [#allocation6 + $0x1], 0 }
   0x9   :  { %16 = vsyncpa [#allocation9], 0 }
   0xa   :  { %17 = vsyncpa [#allocation7], 0 }
   0xb   :  { %19 = vsyncpa [#allocation7 + $0x1], 0  ;;  %s3671_s27 = smov 0   ;;  %s3673_s28 = smov 0  }
   0xc   :  { %s3675_s29 = smov 0   ;;  %s3677_s30 = smov 0  }
   0xd   :  { %s3679_s9 = smov 0   ;;  %s3681_s10 = smov 0  }
   0xe   :  { %s3683_s11 = smov 0   ;;  %s3685_s12 = smov 0  }
   0xf   :  { %s3687_s13 = smov 0   ;;  %s3689_s14 = smov 0  }
  0x10   :  { %s3691_s15 = smov 0  }
  0x11 LB: > { %4997 = sst [smem:[#allocation14_spill]] %s3577_s27  ;;  %s2479_s16 = sadd.s32 4294967295, %s3617_s15   ;;  %s3617_s15 = sphi %s3691_s15, %s25_s15   ;;  %s3613_s14 = sphi %s3689_s14, %s5030_s14   ;;  %s3609_s13 = sphi %s3687_s13, %s5021_s13   ;;  %s3605_s12 = sphi %s3685_s12, %s5029_s12   ;;  %s3601_s11 = sphi %s3683_s11, %s5020_s11   ;;  %s3597_s10 = sphi %s3681_s10, %s5028_s10   ;;  %s3593_s9 = sphi %s3679_s9, %s5027_s9   ;;  %s3589_s30 = sphi %s3677_s30, %s5026_s30   ;;  %s3585_s29 = sphi %s3675_s29, %s5025_s29   ;;  %s3581_s28 = sphi %s3673_s28, %s5024_s28   ;;  %s3577_s27 = sphi %s3671_s27, %s5023_s27  }
  0x12   : > { %4998 = sst [smem:[#allocation15_spill]] %s3605_s12  ;;  %s2480_s17 = sadd.s32 4294967294, %s3617_s15  }
  0x13   : > { %4999 = sst [smem:[#allocation16_spill]] %s3609_s13  ;;  %p57_p0 = scmp.ne.s32.totalorder %s3593_s9, %s3589_s30 }
  0x14   : > { %p3727_p1 = scmp.eq.s32.totalorder %s2479_s16, 0  ;;  %p229_p2 = scmp.ne.s32.totalorder %s3585_s29, %s3581_s28 }
  0x15   : > { %p230_p3 = scmp.eq.s32.totalorder %s2479_s16, 3  ;;  %p235_p5 = scmp.ne.s32.totalorder %s3581_s28, %s3577_s27 }
  0x16   : > { %p3735_p4 = por %p3727_p1, %p57_p0  ;;  %p236_p7 = scmp.eq.s32.totalorder %s2480_s17, 3 }
  0x17   : > { %p3741_p6 = por %p230_p3, %p229_p2  ;;  %p2481_p8 = scmp.ge.s32.totalorder %s3617_s15, 1 }
  0x18   : > { %p243_p9 = scmp.lt.s32.totalorder %s3617_s15, 5  ;;  %p3747_p10 = por %p236_p7, %p235_p5 }
  0x19   : > { %s5002_s20 = scalar_select %p3741_p6, 1, 0 }
  0x1a   : > { %s5004_s21 = scalar_select %p3747_p10, 1, 0 }
  0x1b   : > { %5003 = sst [smem:[#allocation17_spill]] %s5002_s20  ;;  %p3751_p11 = pnand %p2481_p8, %p243_p9 }
  0x1c   : > { %5005 = sst [smem:[#allocation18_spill]] %s5004_s21  ;;  %s3619_s26 = smov [#allocation8]  }
  0x1d   : > { %s5007_s4 = sld [smem:[#allocation22_spill]]  ;;  %p3219_p12 = pneg %p3751_p11 }
  0x1e   : > { %s265_s30 = sshll.u32 %s3619_s26, 4  ;;  %s3620_s16 = smov 192   ;;  %s266_s30 = int_to_ptr.vmem [resolvable:$true] %s265_s30 }
  0x1f   : > { %p3220_p13 = pnand %p3219_p12, %p3727_p1  ;;  %s3621_s17 = smov 12  }
  0x20   : > { %s34_s23 = sadd.s32 1, %s3609_s13  ;;  %s37_s24 = sadd.s32 1, %s3613_s14 }
  0x21   : > { %p35_p0 = scmp.ge.s32.totalorder %s34_s23, 2  ;;  %p51_p2 = scmp.ne.s32.totalorder %s3597_s10, %s3593_s9 }
  0x22   : > { %p52_p3 = scmp.eq.s32.totalorder %s3617_s15, 0  ;;  %p3232_p8 = scmp.lt.s32.totalorder %s3617_s15, 4 }
  0x23   : > { %s263_s25 = sshll.u32 %s5007_s4, 4  ;;  %s44_s4 = sadd.s32 1, %s3597_s10  ;;  %s264_s25 = int_to_ptr.hbm [resolvable:$true] %s263_s25 }
  0x24   : > { %3222 = dma.hbm_to_vmem [thread:$0]  (!%p3220_p13), %s264_s25, 3072, %s266_s30, [#allocation9], %s3620_s16, %s3620_s16, %s3621_s17  }
  0x25   : > { %s5032_s23 = smov (%p35_p0, %s34_s23), 0  ;;  %s5034_s24 = smov (!%p35_p0, %s37_s24), %s3613_s14 }
  0x26   : > { %5008 = sst [smem:[#allocation19_spill]] %s5032_s23  ;;  %p3771_p5 = por %p52_p3, %p51_p2 }
  0x27   : > { %s215_s21 = ssub.s32 %s3609_s13, %s5032_s23  ;;  %p39_p7 = scmp.ge.s32.totalorder %s5034_s24, 2 }
  0x28   : > { %s219_s25 = sadd.s32 1, %s3585_s29  ;;  %s288_s30 = sand.u32 1, %s3597_s10  }
  0x29   : > { %s5036_s24 = smov (%p39_p7, %s5034_s24), 0  ;;  %s2484_s16 = sshll.u32 %s288_s30, 8 }
  0x2a   : > { %5010 = sst [smem:[#allocation20_spill]] %s5036_s24  ;;  %s41_s17 = ssub.s32 %s3613_s14, %s5036_s24 }
  0x2b   : > { %p42_p9 = scmp.eq.s32.totalorder %s41_s17, 0  ;;  %s216_s27 = sor.u32 %s215_s21, %s41_s17 }
  0x2c   : > { %p217_p12 = scmp.eq.s32.totalorder %s216_s27, 0  ;;  %s2805_s20 = sshll.u32 %s3613_s14, 8 }
  0x2d   : > { %s3786_s8 = scalar_select %p42_p9, %s3597_s10, %s44_s4  }
  0x2e   : > { %s3789_s12 = scalar_select %p217_p12, %s3585_s29, %s219_s25  }
  0x2f   : > { %s297_s7 = scalar_lea.hbm %s4973_s0, %s2805_s20  ;;  %s292_s6 = scalar_lea.vmem [#allocation5], %s2484_s16 }
  0x30   : > { %s300_s5 = sshll.u32 %s292_s6, 4  ;;  %s298_s3 = sshll.u32 %s297_s7, 4  ;;  %s301_s5 = int_to_ptr.vmem [resolvable:$true] %s300_s5  ;;  %s299_s3 = int_to_ptr.hbm [resolvable:$true] %s298_s3 }
  0x31   : > { %p3224_p13 = pnand %p3232_p8, %p3771_p5  ;;  %s289_s24 = scalar_lea.sflag [#allocation6], %s288_s30 }
  0x32   : > { %s3622_s21 = smov 128   ;;  %s3623_s27 = smov 8  }
  0x33   : > { %3226 = dma.hbm_to_vmem [thread:$0]  (!%p3224_p13), %s299_s3, 4096, %s301_s5, %s289_s24, %s3622_s21, %s3622_s21, %s3623_s27  }
  0x34   : > { %312 = sbr.rel (%p3751_p11) target bundleno = 1855 (0x73f), region = 52  ;;  %s314_s4 = sand.u32 (!%p3751_p11), 1, %s3593_s9  }
  0x35   : > { %s2488_s13 = sshll.u32 (!%p3751_p11), %s314_s4, 8  ;;  %s315_s20 = scalar_lea.sflag (!%p3751_p11), [#allocation6], %s314_s4 }
  0x36   : > { %s3801_s23 = scalar_lea.vmem (!%p3751_p11), [#allocation5], %s2488_s13 }
  0x39   : > { %3564 = dma.done.wait (%p3735_p4), %s315_s20, 4096  }
  0x3a   : > { %3566 = vsyncadd (%p3735_p4), %s315_s20, 4294963200 }
  0x3b   : > { %3568 = dma.done.wait (%p3727_p1), [#allocation9], 3072  }
  0x3c   : > { %3570 = vsyncadd (%p3727_p1), [#allocation9], 4294964224  ;;  %s354_s3 = sand.u32 1, %s3581_s28   ;;  %p2491_p11 = scmp.ne.s32.totalorder %s3601_s11, 0 }
  0x3d   : > { %s2490_s5 = sshll.u32 %s354_s3, 7  ;;  %s5011_s24 = sld [smem:[#allocation21_spill]] (!%p2491_p11) }
  0x3e   : > { %s3814_s6 = scalar_lea.vmem [#allocation10], %s2490_s5  ;;  %361 = sbr.rel (%p2491_p11) target bundleno = 793 (0x319), region = 64 }
  0x3f   : > { %s5012_s30 = sld [smem:[#allocation23_spill]] (!%p2491_p11) }
  0x43   : > { %v3820_v0 = vld [vmem:[%s4974_s1 + $0x78] sm:$0xff]  ;;  %v3825_v1 = vld [vmem:[%s4974_s1 + $0x70] sm:$0xff]  ;;  %v3831_v2 = vld [vmem:[%s4974_s1 + $0x68] sm:$0xff]  ;;  %vm539_vm0 = vcmask 261120   ;;  %vm516_vm1 = vcmask 1040384  }
  0x44   : > { %518 = vmatpush.msra.mxu0 %v3820_v0  ;;  %v3837_v3 = vld [vmem:[%s4974_s1 + $0x60] sm:$0xff]  ;;  %v3844_v5 = vld [vmem:[%s3801_s23 + $0x8] sm:$0xff]  ;;  %v3849_v6 = vld [vmem:[%s4974_s1 + $0x58] sm:$0xff]  ;;  %2492 = vmatpush.xpose.msk.msra.mxu1 %vm539_vm0, %v3820_v0 }
  0x45   : > { %v3841_v4 = vld [vmem:[%s3801_s23] sm:$0xff]  ;;  %v3852_v7 = vld [vmem:[%s3801_s23 + $0x10] sm:$0xff]  ;;  %v3855_v8 = vld [vmem:[%s3801_s23 + $0x18] sm:$0xff]  ;;  %v448_v11 = vmul.f32 %v3844_v5, %v3844_v5 }
  0x46   : > { %519 = vmatpush.msra.mxu0 %v3825_v1  ;;  %v410_v9 = vadd.f32 %v3844_v5, %v3841_v4  ;;  %v447_v10 = vmul.f32 %v3841_v4, %v3841_v4  ;;  %v449_v12 = vmul.f32 %v3852_v7, %v3852_v7  ;;  %v3869_v13 = vld [vmem:[%s4974_s1 + $0x50] sm:$0xff]  ;;  %v3872_v14 = vld [vmem:[%s3801_s23 + $0x20] sm:$0xff]  ;;  %v450_v16 = vmul.f32 %v3855_v8, %v3855_v8  ;;  %v3881_v18 = vld [vmem:[%s4974_s1 + $0x48] sm:$0xff] }
  0x47   : > { %v3884_v19 = vld [vmem:[%s3801_s23 + $0x28] sm:$0xff]  ;;  %v451_v21 = vmul.f32 %v3872_v14, %v3872_v14  ;;  %v3893_v23 = vld [vmem:[%s4974_s1 + $0x40] sm:$0xff]  ;;  %v3896_v24 = vld [vmem:[%s3801_s23 + $0x30] sm:$0xff] }
  0x48   : > { %520 = vmatpush.msra.mxu0 %v3831_v2  ;;  %v411_v15 = vadd.f32 %v410_v9, %v3852_v7  ;;  %v479_v17 = vadd.f32 %v448_v11, %v447_v10  ;;  %v452_v26 = vmul.f32 %v3884_v19, %v3884_v19  ;;  %v3905_v28 = vld [vmem:[%s4974_s1 + $0x38] sm:$0xff]  ;;  %v3915_v31 = vld [vmem:[%s4974_s1 + $0x30] sm:$0xff]  ;;  %v453_v32 = vmul.f32 %v3896_v24, %v3896_v24  ;;  %v3920_v34 = vld [vmem:[%s3801_s23 + $0x40] sm:$0xff] }
  0x49   : > { %v3908_v29 = vld [vmem:[%s3801_s23 + $0x38] sm:$0xff]  ;;  %v3929_v38 = vld [vmem:[%s4974_s1 + $0x28] sm:$0xff]  ;;  %v455_v41 = vmul.f32 %v3920_v34, %v3920_v34  ;;  %v3941_v43 = vld [vmem:[%s4974_s1 + $0x20] sm:$0xff]  ;;  %2493 = vmatpush.xpose.msk.msra.mxu1 %vm539_vm0, %v3825_v1 }
  0x4a   : > { %521 = vmatpush.msra.mxu0 %v3837_v3  ;;  %v412_v20 = vadd.f32 %v411_v15, %v3855_v8  ;;  %v480_v22 = vadd.f32 %v479_v17, %v449_v12  ;;  %v454_v36 = vmul.f32 %v3908_v29, %v3908_v29  ;;  %v3932_v39 = vld [vmem:[%s3801_s23 + $0x48] sm:$0xff]  ;;  %v3944_v44 = vld [vmem:[%s3801_s23 + $0x50] sm:$0xff]  ;;  %v3953_v48 = vld [vmem:[%s4974_s1 + $0x18] sm:$0xff] }
  0x4b   : > { %v456_v46 = vmul.f32 %v3932_v39, %v3932_v39  ;;  %v3956_v49 = vld [vmem:[%s3801_s23 + $0x58] sm:$0xff]  ;;  %v457_v51 = vmul.f32 %v3944_v44, %v3944_v44  ;;  %v3965_v53 = vld [vmem:[%s4974_s1 + $0x10] sm:$0xff]  ;;  %v3968_v54 = vld [vmem:[%s3801_s23 + $0x60] sm:$0xff] }
  0x4c   : > { %522 = vmatpush.msra.mxu0 %v3849_v6  ;;  %v413_v25 = vadd.f32 %v412_v20, %v3872_v14  ;;  %v481_v27 = vadd.f32 %v480_v22, %v450_v16  ;;  %v458_v56 = vmul.f32 %v3956_v49, %v3956_v49  ;;  %v3977_v58 = vld [vmem:[%s4974_s1 + $0x8] sm:$0xff]  ;;  %v459_v61 = vmul.f32 %v3968_v54, %v3968_v54  ;;  %v3989_v63 = vld [vmem:[%s4974_s1] sm:$0xff]  ;;  %v3992_v9 = vld [vmem:[%s3801_s23 + $0x70] sm:$0xff] }
  0x4d   : > { %v3980_v59 = vld [vmem:[%s3801_s23 + $0x68] sm:$0xff]  ;;  %v3999_v15 = vld [vmem:[%s3801_s23 + $0x78] sm:$0xff]  ;;  %v461_v17 = vmul.f32 %v3992_v9, %v3992_v9  ;;  %2494 = vmatpush.xpose.msk.msra.mxu1 %vm539_vm0, %v3831_v2 }
  0x4e   : > { %523 = vmatpush.msra.mxu0 %v3869_v13  ;;  %v414_v30 = vadd.f32 %v413_v25, %v3884_v19  ;;  %v482_v33 = vadd.f32 %v481_v27, %v451_v21  ;;  %v460_v11 = vmul.f32 %v3980_v59, %v3980_v59  ;;  %v4006_v21 = vld [vmem:[%s3801_s23 + $0x80] sm:$0xff]  ;;  %v462_v25 = vmul.f32 %v3999_v15, %v3999_v15  ;;  %v4012_v27 = vld [vmem:[%s3801_s23 + $0x88] sm:$0xff]  ;;  %v4102_v1 = vld [vmem:[%s3801_s23 + $0xf8] sm:$0xff] }
  0x4f   : > { %v4088_v0 = vld [vmem:[%s3801_s23 + $0xe8] sm:$0xff] }
  0x50   : > { %524 = vmatpush.msra.mxu0 %v3881_v18  ;;  %v415_v35 = vadd.f32 %v414_v30, %v3896_v24  ;;  %v483_v37 = vadd.f32 %v482_v33, %v452_v26 }
  0x51   : > { %2495 = vmatpush.xpose.msk.msra.mxu1 %vm539_vm0, %v3837_v3 }
  0x52   : > { %525 = vmatpush.msra.mxu0 %v3893_v23  ;;  %v416_v40 = vadd.f32 %v415_v35, %v3908_v29  ;;  %v484_v42 = vadd.f32 %v483_v37, %v453_v32  ;;  %v463_v32 = vmul.f32 %v4006_v21, %v4006_v21  ;;  %v4018_v35 = vld [vmem:[%s3801_s23 + $0x90] sm:$0xff]  ;;  %v464_v37 = vmul.f32 %v4012_v27, %v4012_v27 }
  0x54   : > { %526 = vmatpush.msra.mxu0 %v3905_v28  ;;  %v417_v45 = vadd.f32 %v416_v40, %v3920_v34  ;;  %v485_v47 = vadd.f32 %v484_v42, %v454_v36 }
  0x55   : > { %2496 = vmatpush.xpose.msk.msra.mxu1 %vm539_vm0, %v3849_v6 }
  0x56   : > { %527 = vmatpush.msra.mxu0 %v3915_v31  ;;  %v418_v50 = vadd.f32 %v417_v45, %v3932_v39  ;;  %v486_v52 = vadd.f32 %v485_v47, %v455_v41  ;;  %v4024_v41 = vld [vmem:[%s3801_s23 + $0x98] sm:$0xff]  ;;  %v465_v45 = vmul.f32 %v4018_v35, %v4018_v35  ;;  %v4030_v47 = vld [vmem:[%s3801_s23 + $0xa0] sm:$0xff] }
  0x58   : > { %528 = vmatpush.msra.mxu0 %v3929_v38  ;;  %v419_v55 = vadd.f32 %v418_v50, %v3944_v44  ;;  %v487_v57 = vadd.f32 %v486_v52, %v456_v46 }
  0x59   : > { %2497 = vmatpush.xpose.msk.msra.mxu1 %vm539_vm0, %v3869_v13 }
  0x5a   : > { %529 = vmatpush.msra.mxu0 %v3941_v43  ;;  %v420_v60 = vadd.f32 %v419_v55, %v3956_v49  ;;  %v488_v62 = vadd.f32 %v487_v57, %v457_v51  ;;  %v466_v51 = vmul.f32 %v4024_v41, %v4024_v41  ;;  %v4036_v55 = vld [vmem:[%s3801_s23 + $0xa8] sm:$0xff]  ;;  %v467_v57 = vmul.f32 %v4030_v47, %v4030_v47 }
  0x5c   : > { %530 = vmatpush.msra.mxu0 %v3953_v48  ;;  %v421_v10 = vadd.f32 %v420_v60, %v3968_v54  ;;  %v489_v12 = vadd.f32 %v488_v62, %v458_v56 }
  0x5d   : > { %2498 = vmatpush.xpose.msk.msra.mxu1 %vm539_vm0, %v3881_v18 }
  0x5e   : > { %531 = vmatpush.msra.mxu0 %v3965_v53  ;;  %v422_v16 = vadd.f32 %v421_v10, %v3980_v59  ;;  %v490_v20 = vadd.f32 %v489_v12, %v459_v61  ;;  %v4042_v61 = vld [vmem:[%s3801_s23 + $0xb0] sm:$0xff]  ;;  %v468_v10 = vmul.f32 %v4036_v55, %v4036_v55  ;;  %v4048_v12 = vld [vmem:[%s3801_s23 + $0xb8] sm:$0xff] }
  0x60   : > { %532 = vmatpush.msra.mxu0 %v3977_v58  ;;  %v423_v22 = vadd.f32 %v422_v16, %v3992_v9  ;;  %v491_v26 = vadd.f32 %v490_v20, %v460_v11 }
  0x61   : > { %2499 = vmatpush.xpose.msk.msra.mxu1 %vm539_vm0, %v3893_v23  ;;  %v2595_v23 = vld [vmem:[#allocation8 + $0xa8] sm:$0xf] }
  0x62   : > { %533 = vmatpush.msra.mxu0 %v3989_v63  ;;  %v424_v30 = vadd.f32 %v423_v22, %v3999_v15  ;;  %v492_v33 = vadd.f32 %v491_v26, %v461_v17  ;;  %v469_v17 = vmul.f32 %v4042_v61, %v4042_v61  ;;  %v4054_v22 = vld [vmem:[%s3801_s23 + $0xc0] sm:$0xff]  ;;  %v470_v26 = vmul.f32 %v4048_v12, %v4048_v12 }
  0x64   : > { %v425_v36 = vadd.f32 %v424_v30, %v4006_v21  ;;  %v493_v40 = vadd.f32 %v492_v33, %v462_v25 }
  0x65   : > { %2500 = vmatpush.xpose.msk.msra.mxu1 %vm539_vm0, %v3905_v28  ;;  %v2828_v28 = vld [vmem:[#allocation8 + $0xb0] sm:$0xf0] }
  0x66   : > { %v426_v42 = vadd.f32 %v425_v36, %v4012_v27  ;;  %v494_v46 = vadd.f32 %v493_v40, %v463_v32  ;;  %v4060_v32 = vld [vmem:[%s3801_s23 + $0xc8] sm:$0xff]  ;;  %v471_v36 = vmul.f32 %v4054_v22, %v4054_v22  ;;  %v4066_v40 = vld [vmem:[%s3801_s23 + $0xd0] sm:$0xff] }
  0x68   : > { %v427_v50 = vadd.f32 %v426_v42, %v4018_v35  ;;  %v495_v52 = vadd.f32 %v494_v46, %v464_v37 }
  0x69   : > { %2501 = vmatpush.xpose.msk.msra.mxu1 %vm539_vm0, %v3915_v31  ;;  %v2827_v31 = vld [vmem:[#allocation8 + $0xac] sm:$0xf] }
  0x6a   : > { %v428_v56 = vadd.f32 %v427_v50, %v4024_v41  ;;  %v496_v60 = vadd.f32 %v495_v52, %v465_v45  ;;  %v472_v45 = vmul.f32 %v4060_v32, %v4060_v32  ;;  %v4074_v50 = vld [vmem:[%s3801_s23 + $0xd8] sm:$0xff]  ;;  %v473_v52 = vmul.f32 %v4066_v40, %v4066_v40 }
  0x6c   : > { %v429_v62 = vadd.f32 %v428_v56, %v4030_v47  ;;  %v497_v11 = vadd.f32 %v496_v60, %v466_v51 }
  0x6d   : > { %2502 = vmatpush.xpose.msk.msra.mxu1 %vm539_vm0, %v3929_v38  ;;  %v2596_v38 = vor.u32 %v2828_v28, %v2595_v23  ;;  %v2567_v23 = vld [vmem:[#allocation8 + $0x68] sm:$0xf]  ;;  %v2820_v28 = vld [vmem:[#allocation8 + $0x70] sm:$0xf0] }
  0x6e   : > { %v430_v16 = vadd.f32 %v429_v62, %v4036_v55  ;;  %v498_v20 = vadd.f32 %v497_v11, %v467_v57  ;;  %v4080_v57 = vld [vmem:[%s3801_s23 + $0xe0] sm:$0xff]  ;;  %v474_v62 = vmul.f32 %v4074_v50, %v4074_v50 }
  0x6f   : > { %3163 = vmatpush.bf16.msra.mxu2 %v2596_v38 }
  0x70   : > { %v431_v25 = vadd.f32 %v430_v16, %v4042_v61  ;;  %v499_v30 = vadd.f32 %v498_v20, %v468_v10  ;;  %v475_v16 = vmul.f32 %v4080_v57, %v4080_v57  ;;  %v4094_v20 = vld [vmem:[%s3801_s23 + $0xf0] sm:$0xff] }
  0x71   : > { %2503 = vmatpush.xpose.msk.msra.mxu1 %vm539_vm0, %v3941_v43  ;;  %v2597_v43 = vld [vmem:[#allocation8 + $0xb4] sm:$0xf0] }
  0x72   : > { %v432_v33 = vadd.f32 %v431_v25, %v4048_v12  ;;  %v500_v37 = vadd.f32 %v499_v30, %v469_v17 }
  0x74   : > { %v433_v42 = vadd.f32 %v432_v33, %v4054_v22  ;;  %v501_v46 = vadd.f32 %v500_v37, %v470_v26  ;;  %v476_v26 = vmul.f32 %v4088_v0, %v4088_v0 }
  0x75   : > { %2504 = vmatpush.xpose.msk.msra.mxu1 %vm539_vm0, %v3953_v48  ;;  %v2829_v48 = vld [vmem:[#allocation8 + $0xb8] sm:$0xf0] }
  0x76   : > { %v434_v51 = vadd.f32 %v433_v42, %v4060_v32  ;;  %v502_v56 = vadd.f32 %v501_v46, %v471_v36  ;;  %v477_v36 = vmul.f32 %v4094_v20, %v4094_v20 }
  0x78   : > { %v435_v60 = vadd.f32 %v434_v51, %v4066_v40  ;;  %v503_v10 = vadd.f32 %v502_v56, %v472_v45  ;;  %v478_v45 = vmul.f32 %v4102_v1, %v4102_v1 }
  0x79   : > { %2505 = vmatpush.xpose.msk.msra.mxu1 %vm539_vm0, %v3965_v53 }
  0x7a   : > { %v436_v11 = vadd.f32 %v435_v60, %v4074_v50  ;;  %v504_v17 = vadd.f32 %v503_v10, %v473_v52 }
  0x7c   : > { %v437_v25 = vadd.f32 %v436_v11, %v4080_v57  ;;  %v505_v30 = vadd.f32 %v504_v17, %v474_v62 }
  0x7d   : > { %2506 = vmatpush.xpose.msk.msra.mxu1 %vm539_vm0, %v3977_v58  ;;  %v2583_v58 = vld [vmem:[#allocation8 + $0x90] sm:$0xf] }
  0x7e   : > { %v438_v33 = vadd.f32 %v437_v25, %v4088_v0  ;;  %v506_v37 = vadd.f32 %v505_v30, %v475_v16 }
  0x80   : > { %v439_v42 = vadd.f32 %v438_v33, %v4094_v20  ;;  %v507_v46 = vadd.f32 %v506_v37, %v476_v26  ;;  %v4138_v37 = vor.u32 %v2827_v31, %v2597_v43  ;;  %v2547_v43 = vld [vmem:[#allocation8 + $0x48] sm:$0xf] }
  0x81   : > { %2507 = vmatpush.xpose.msk.msra.mxu1 %vm539_vm0, %v3989_v63  ;;  %v2825_v63 = vld [vmem:[#allocation8 + $0x98] sm:$0xf0] }
  0x82   : > { %v440_v51 = vadd.f32 %v439_v42, %v4102_v1  ;;  %v508_v2 = vadd.f32 %v507_v46, %v477_v36  ;;  %v2603_v36 = vld [vmem:[#allocation8 + $0xb0] sm:$0xf]  ;;  %3171 = vmatpush.bf16.msra.mxu3 %v4138_v37  ;;  %v2824_v42 = vld [vmem:[#allocation8 + $0x94] sm:$0xf]  ;;  %v2585_v46 = vld [vmem:[#allocation8 + $0x9c] sm:$0xf0] }
  0x83   : > { %v4140_v53 = vor.u32 %v2829_v48, %v2603_v36  ;;  %v2816_v36 = vld [vmem:[#allocation8 + $0x50] sm:$0xf0]  ;;  %v2815_v48 = vld [vmem:[#allocation8 + $0x4c] sm:$0xf] }
  0x84   : > { %v441_v52 = vrot.slane %v440_v51, 4  ;;  %v509_v56 = vadd.f32 %v508_v2, %v478_v45  ;;  %v2584_v45 = vor.u32 %v2825_v63, %v2583_v58  ;;  %v2826_v2 = vld [vmem:[#allocation8 + $0xa0] sm:$0xf0]  ;;  %v2548_v58 = vor.u32 %v2816_v36, %v2547_v43  ;;  %v2549_v63 = vld [vmem:[#allocation8 + $0x54] sm:$0xf0] }
  0x85   : > { %950 = vmatpush.bf16.msrb.mxu1 %v2596_v38  ;;  %1128 = vmatpush.bf16.msrb.mxu0 %v4140_v53  ;;  %v4158_v38 = vor.u32 %v2820_v28, %v2567_v23  ;;  %v2525_v23 = vld [vmem:[#allocation8 + $0x24] sm:$0xf0]  ;;  %v2531_v28 = vld [vmem:[#allocation8 + $0x20] sm:$0xf]  ;;  %v2811_v43 = vld [vmem:[#allocation8 + $0x28] sm:$0xf0] }
  0x86   : > { %v442_v60 = vadd.f32 %v441_v52, %v440_v51  ;;  %v510_v62 = vrot.slane %v509_v56, 4  ;;  %v2591_v51 = vld [vmem:[#allocation8 + $0x98] sm:$0xf]  ;;  %v4144_v52 = vor.u32 %v2824_v42, %v2585_v46  ;;  %3164 = vmatpush.bf16.msra.mxu2 %v2584_v45  ;;  %v2555_v42 = vld [vmem:[#allocation8 + $0x50] sm:$0xf]  ;;  %v2552_v46 = vor.u32 %v2815_v48, %v2549_v63 }
  0x87   : > { %v4168_v48 = vor.u32 %v2811_v43, %v2531_v28  ;;  %v2807_v63 = vld [vmem:[#allocation8 + $0x8] sm:$0xf0] }
  0x88   : > { %v443_v10 = vrot.slane %v442_v60, 2  ;;  %v511_v11 = vadd.f32 %v510_v62, %v509_v56  ;;  %v4146_v56 = vor.u32 %v2826_v2, %v2591_v51  ;;  %3172 = vmatpush.bf16.msra.mxu3 %v4144_v52  ;;  %v2822_v62 = vld [vmem:[#allocation8 + $0x80] sm:$0xf0]  ;;  %v2535_v2 = vld [vmem:[#allocation8 + $0x30] sm:$0xf] }
  0x89   : > { %951 = vmatpush.bf16.msrb.mxu1 %v2584_v45  ;;  %v2817_v45 = vld [vmem:[#allocation8 + $0x58] sm:$0xf0] }
  0x8a   : > { %v444_v16 = vadd.f32 %v443_v10, %v442_v60  ;;  %v512_v17 = vrot.slane %v511_v11, 2  ;;  %1129 = vmatpush.bf16.msrb.mxu0 %v4146_v56  ;;  %v2571_v60 = vld [vmem:[#allocation8 + $0x78] sm:$0xf]  ;;  %v2821_v10 = vld [vmem:[#allocation8 + $0x7c] sm:$0xf]  ;;  %v4162_v51 = vor.u32 %v2817_v45, %v2555_v42 }
  0x8b   : > { %v2806_v42 = vld [vmem:[#allocation8 + $0x4] sm:$0xf] }
  0x8c   : > { %v445_v25 = vrot.slane %v444_v16, 1  ;;  %v513_v26 = vadd.f32 %v512_v17, %v511_v11  ;;  %v2572_v11 = vor.u32 %v2822_v62, %v2571_v60  ;;  %v2579_v17 = vld [vmem:[#allocation8 + $0x80] sm:$0xf]  ;;  %v2813_v60 = vld [vmem:[#allocation8 + $0x38] sm:$0xf0] }
  0x8d   : > { %v2812_v62 = vld [vmem:[#allocation8 + $0x34] sm:$0xf] }
  0x8e   : > { %v446_v3 = vadd.f32 %v445_v25, %v444_v16  ;;  %v514_v30 = vrot.slane %v513_v26, 1  ;;  %v2573_v16 = vld [vmem:[#allocation8 + $0x84] sm:$0xf0]  ;;  %v2823_v25 = vld [vmem:[#allocation8 + $0x88] sm:$0xf0]  ;;  %952 = vmatpush.bf16.msrb.mxu1 %v2572_v11  ;;  %3165 = vmatpush.bf16.msra.mxu2 %v2572_v11 }
  0x8f   : > { %v2537_v11 = vld [vmem:[#allocation8 + $0x3c] sm:$0xf0] }
  0x90   : > { %v515_v33 = vadd.f32 %v514_v30, %v513_v26  ;;  %v4150_v26 = vor.u32 %v2821_v10, %v2573_v16  ;;  %v2559_v30 = vld [vmem:[#allocation8 + $0x60] sm:$0xf]  ;;  %v2536_v10 = vor.u32 %v2813_v60, %v2535_v2  ;;  %v2543_v16 = vld [vmem:[#allocation8 + $0x38] sm:$0xf]  ;;  %v2513_v60 = vld [vmem:[#allocation8 + $0xc] sm:$0xf0] }
  0x92   : > { %v517_v6 = vsel %vm516_vm1, %v446_v3, %v515_v33  ;;  %v4152_v3 = vor.u32 %v2823_v25, %v2579_v17  ;;  %3173 = vmatpush.bf16.msra.mxu3 %v4150_v26  ;;  %v2819_v33 = vld [vmem:[#allocation8 + $0x68] sm:$0xf0]  ;;  %v2814_v17 = vld [vmem:[#allocation8 + $0x40] sm:$0xf0]  ;;  %v2540_v25 = vor.u32 %v2812_v62, %v2537_v11  ;;  %v2519_v62 = vld [vmem:[#allocation8 + $0x8] sm:$0xf] }
  0x93   : > { %534 = vmatmul.f32.vlgmr.msra.gmra.mxu0 %v517_v6  ;;  %v2818_v6 = vld [vmem:[#allocation8 + $0x64] sm:$0xf] }
  0x94   : > { %1130 = vmatpush.bf16.msrb.mxu0 %v4152_v3 }
  0x98   : > { %1131 = vmatpush.bf16.msrb.mxu0 %v4158_v38 }
  0x9c   : > { %1132 = vmatpush.bf16.msrb.mxu0 %v4162_v51 }
 0x110   : > { %v535_v13 = vpop.f32.mrf.mxu0 }
 0x111   : > { %v538_v18 = vmul.f32 0.0009765625, %v535_v13  ;;  %v2560_v13 = vor.u32 %v2819_v33, %v2559_v30  ;;  %v4165_v30 = vor.u32 %v2814_v17, %v2543_v16  ;;  %v2523_v33 = vld [vmem:[#allocation8 + $0x18] sm:$0xf]  ;;  %v4171_v16 = vor.u32 %v2806_v42, %v2513_v60 }
 0x113   : > { %2508 = vmatmul.msk.f32.vlgmr.msra.gmra.mxu1 %vm539_vm0, %v538_v18  ;;  %v2561_v18 = vld [vmem:[#allocation8 + $0x6c] sm:$0xf0]  ;;  %3166 = vmatpush.bf16.msra.mxu2 %v2560_v13 }
 0x114   : > { %v4156_v31 = vor.u32 %v2818_v6, %v2561_v18  ;;  %953 = vmatpush.bf16.msrb.mxu1 %v2560_v13  ;;  %1133 = vmatpush.bf16.msrb.mxu0 %v4165_v30  ;;  %v2810_v6 = vld [vmem:[#allocation8 + $0x20] sm:$0xf0]  ;;  %v2809_v13 = vld [vmem:[#allocation8 + $0x1c] sm:$0xf] }
 0x115   : > { %v2524_v18 = vor.u32 %v2810_v6, %v2523_v33  ;;  %v2528_v36 = vor.u32 %v2809_v13, %v2525_v23 }
 0x116   : > { %3174 = vmatpush.bf16.msra.mxu3 %v4156_v31 }
 0x117   : > { %3167 = vmatpush.bf16.msra.mxu2 %v2548_v58 }
 0x118   : > { %954 = vmatpush.bf16.msrb.mxu1 %v2548_v58  ;;  %v2511_v58 = vld [vmem:[#allocation8] sm:$0xf]  ;;  %1134 = vmatpush.bf16.msrb.mxu0 %v4168_v48 }
 0x119   : > { %v2512_v2 = vor.u32 %v2807_v63, %v2511_v58 }
 0x11a   : > { %3175 = vmatpush.bf16.msra.mxu3 %v2552_v46 }
 0x11b   : > { %3168 = vmatpush.bf16.msra.mxu2 %v2536_v10 }
 0x11c   : > { %955 = vmatpush.bf16.msrb.mxu1 %v2536_v10  ;;  %v2808_v10 = vld [vmem:[#allocation8 + $0x10] sm:$0xf0] }
 0x11d   : > { %v4173_v17 = vor.u32 %v2808_v10, %v2519_v62 }
 0x11e   : > { %3176 = vmatpush.bf16.msra.mxu3 %v2540_v25 }
 0x11f   : > { %3169 = vmatpush.bf16.msra.mxu2 %v2524_v18  ;;  %1135 = vmatpush.bf16.msrb.mxu0 %v4173_v17 }
 0x120   : > { %956 = vmatpush.bf16.msrb.mxu1 %v2524_v18 }
 0x122   : > { %3177 = vmatpush.bf16.msra.mxu3 %v2528_v36 }
 0x123   : > { %3170 = vmatpush.bf16.msra.mxu2 %v2512_v2 }
 0x124   : > { %957 = vmatpush.bf16.msrb.mxu1 %v2512_v2 }
 0x126   : > { %3178 = vmatpush.bf16.msra.mxu3 %v4171_v16 }
 0x128   : > { %1039 = vmatpush.bf16.msra.mxu1 %v4138_v37 }
 0x12c   : > { %1040 = vmatpush.bf16.msra.mxu1 %v4144_v52 }
 0x130   : > { %1041 = vmatpush.bf16.msra.mxu1 %v4150_v26 }
 0x134   : > { %1042 = vmatpush.bf16.msra.mxu1 %v4156_v31 }
 0x138   : > { %1043 = vmatpush.bf16.msra.mxu1 %v2552_v46 }
 0x13c   : > { %1044 = vmatpush.bf16.msra.mxu1 %v2540_v25 }
 0x140   : > { %1045 = vmatpush.bf16.msra.mxu1 %v2528_v36 }
 0x144   : > { %1046 = vmatpush.bf16.msra.mxu1 %v4171_v16 }
 0x190   : > { %v608_v45 = vpop.f32.mrf.mxu1 }
 0x191   : > { %v611_v11 = vmul.f32 %v608_v45, %v608_v45  ;;  %v4181_v58 = vperm.slane %v608_v45, 0 }
 0x193   : > { %v613_v33 = vrot.slane %v611_v11, 7  ;;  %v618_v37 = vsub.f32 %v3841_v4, %v4181_v58  ;;  %v619_v52 = vsub.f32 %v3844_v5, %v4181_v58  ;;  %v622_v26 = vsub.f32 %v3872_v14, %v4181_v58 }
 0x194   : > { %v623_v31 = vsub.f32 %v3884_v19, %v4181_v58  ;;  %v620_v46 = vsub.f32 %v3852_v7, %v4181_v58  ;;  %v624_v4 = vsub.f32 %v3896_v24, %v4181_v58  ;;  %v625_v5 = vsub.f32 %v3908_v29, %v4181_v58 }
 0x195   : > { %v615_v6 = vsub.f32 %v608_v45, %v613_v33  ;;  %v621_v45 = vsub.f32 %v3855_v8, %v4181_v58  ;;  %v626_v14 = vsub.f32 %v3920_v34, %v4181_v58  ;;  %v627_v19 = vsub.f32 %v3932_v39, %v4181_v58  ;;  %v4210_v8 = vld [vmem:[%s4975_s2] ss:$0 sm:$0xff] }
 0x196   : > { %v630_v25 = vsub.f32 %v3968_v54, %v4181_v58  ;;  %v631_v24 = vsub.f32 %v3980_v59, %v4181_v58  ;;  %v642_v29 = vsub.f32 %v4054_v22, %v4181_v58  ;;  %v643_v34 = vsub.f32 %v4060_v32, %v4181_v58  ;;  %v4231_v32 = vld [vmem:[%s5011_s24] ss:$0 sm:$0xff] }
 0x197   : > { %v616_v13 = vmax.f32 %v615_v6, 0.0  ;;  %v632_v39 = vsub.f32 %v3992_v9, %v4181_v58  ;;  %v633_v54 = vsub.f32 %v3999_v15, %v4181_v58  ;;  %v644_v62 = vsub.f32 %v4066_v40, %v4181_v58 }
 0x198   : > { %v645_v10 = vsub.f32 %v4074_v50, %v4181_v58  ;;  %v646_v16 = vsub.f32 %v4080_v57, %v4181_v58  ;;  %v638_v57 = vsub.f32 %v4030_v47, %v4181_v58 }
 0x199   : > { %v650_v18 = vadd.f32 1e-05, %v616_v13 }
 0x19b   : > { %3332 = vrsqrt.f32 %v650_v18  ;;  %vm657_vm3 = vweird.f32 %v650_v18 }
 0x1a1   : > { %v3333_v23 = vpop.eup %3332 }
 0x1a2   : > { %v652_v28 = vmul.f32 %v3333_v23, %v650_v18  ;;  %vm658_vm2 = vweird.f32 %v3333_v23 }
 0x1a3   : > { %vm659_vm4 = vmor %vm657_vm3, %vm658_vm2 }
 0x1a4   : > { %v653_v43 = vmul.f32 %v3333_v23, %v652_v28 }
 0x1a6   : > { %v654_v63 = vmul.f32 0.5, %v653_v43 }
 0x1a8   : > { %v655_v42 = vsub.f32 1.5, %v654_v63 }
 0x1aa   : > { %v656_v2 = vmul.f32 %v3333_v23, %v655_v42 }
 0x1ac   : > { %v660_v60 = vsel %vm659_vm4, %v3333_v23, %v656_v2 }
 0x1ad   : > { %v4205_v7 = vperm.slane %v660_v60, 1  ;;  %v636_v60 = vsub.f32 %v4018_v35, %v4181_v58 }
 0x1af   : > { %v662_v59 = vmul.f32 %v4205_v7, %v618_v37  ;;  %v663_v22 = vmul.f32 %v4205_v7, %v619_v52  ;;  %v666_v9 = vmul.f32 %v4205_v7, %v622_v26  ;;  %v667_v36 = vmul.f32 %v4205_v7, %v623_v31 }
 0x1b0   : > { %v664_v11 = vmul.f32 %v4205_v7, %v620_v46  ;;  %v665_v33 = vmul.f32 %v4205_v7, %v621_v45  ;;  %v668_v6 = vmul.f32 %v4205_v7, %v624_v4  ;;  %v669_v13 = vmul.f32 %v4205_v7, %v625_v5 }
 0x1b1   : > { %v698_v18 = vmul.f32 %v4210_v8, %v662_v59  ;;  %v699_v23 = vmul.f32 %v4210_v8, %v663_v22  ;;  %v702_v28 = vmul.f32 %v4210_v8, %v666_v9  ;;  %v703_v43 = vmul.f32 %v4210_v8, %v667_v36 }
 0x1b2   : > { %v700_v63 = vmul.f32 %v4210_v8, %v664_v11  ;;  %v701_v42 = vmul.f32 %v4210_v8, %v665_v33  ;;  %v634_v37 = vsub.f32 %v4006_v21, %v4181_v58  ;;  %v635_v52 = vsub.f32 %v4012_v27, %v4181_v58 }
 0x1b3   : > { %v734_v2 = vadd.f32 %v4231_v32, %v698_v18  ;;  %v735_v26 = vadd.f32 %v4231_v32, %v699_v23  ;;  %v738_v31 = vadd.f32 %v4231_v32, %v702_v28  ;;  %v739_v46 = vadd.f32 %v4231_v32, %v703_v43 }
 0x1b4   : > { %v704_v45 = vmul.f32 %v4210_v8, %v668_v6  ;;  %v705_v4 = vmul.f32 %v4210_v8, %v669_v13  ;;  %v647_v21 = vsub.f32 %v4088_v0, %v4181_v58  ;;  %v637_v59 = vsub.f32 %v4024_v41, %v4181_v58 }
 0x1b5   : > { %v4260_v5 = vpack.c.bf16 %v735_v26, %v734_v2  ;;  %v4262_v27 = vpack.c.bf16 %v739_v46, %v738_v31  ;;  %v648_v22 = vsub.f32 %v4094_v20, %v4181_v58  ;;  %v649_v9 = vsub.f32 %v4102_v1, %v4181_v58 }
 0x1b6   : > { %v639_v0 = vsub.f32 %v4036_v55, %v4181_v58  ;;  %v736_v35 = vadd.f32 %v4231_v32, %v700_v63  ;;  %v737_v41 = vadd.f32 %v4231_v32, %v701_v42  ;;  %v674_v36 = vmul.f32 %v4205_v7, %v630_v25 }
 0x1b7   : > { %958 = vmatmul.bf16.vlgmr.msrb.gmra.mxu1 %v4260_v5  ;;  %968 = vmatmul.bf16.vlgmr.msra.gmra.mxu2 %v4262_v27  ;;  %v740_v11 = vadd.f32 %v4231_v32, %v704_v45  ;;  %v741_v33 = vadd.f32 %v4231_v32, %v705_v4  ;;  %v675_v6 = vmul.f32 %v4205_v7, %v631_v24 }
 0x1b8   : > { %1057 = vmatmul.bf16.vlgmr.msra.gmra.mxu3 %v4262_v27  ;;  %1136 = vmatmul.bf16.vlgmr.msrb.gmra.mxu0 %v4260_v5  ;;  %v710_v13 = vmul.f32 %v4210_v8, %v674_v36  ;;  %v686_v18 = vmul.f32 %v4205_v7, %v642_v29  ;;  %v640_v23 = vsub.f32 %v4042_v61, %v4181_v58 }
 0x1b9   : > { %3179 = vmatpush.bf16.msrb.mxu1 %v4140_v53  ;;  %v641_v25 = vsub.f32 %v4048_v12, %v4181_v58  ;;  %v4294_v28 = vmul.f32 %v4205_v7, %v626_v14  ;;  %v4297_v43 = vmul.f32 %v4205_v7, %v627_v19  ;;  %v711_v24 = vmul.f32 %v4210_v8, %v675_v6 }
 0x1ba   : > { %v687_v53 = vmul.f32 %v4205_v7, %v643_v34  ;;  %v4301_v63 = vpack.c.bf16 %v737_v41, %v736_v35  ;;  %v746_v29 = vadd.f32 %v4231_v32, %v710_v13  ;;  %v722_v42 = vmul.f32 %v4210_v8, %v686_v18 }
 0x1bb   : > { %v676_v2 = vmul.f32 %v4205_v7, %v632_v39  ;;  %v4306_v26 = vpack.c.bf16 %v741_v33, %v740_v11  ;;  %v747_v14 = vadd.f32 %v4231_v32, %v711_v24  ;;  %v677_v19 = vmul.f32 %v4205_v7, %v633_v54 }
 0x1bc   : > { %v723_v31 = vmul.f32 %v4210_v8, %v687_v53  ;;  %v758_v34 = vadd.f32 %v4231_v32, %v722_v42  ;;  %v688_v39 = vmul.f32 %v4205_v7, %v644_v62  ;;  %v689_v45 = vmul.f32 %v4205_v7, %v645_v10 }
 0x1bd   : > { %3180 = vmatpush.bf16.msrb.mxu1 %v4146_v56  ;;  %v712_v46 = vmul.f32 %v4210_v8, %v676_v2  ;;  %v4325_v4 = vpack.c.bf16 %v747_v14, %v746_v29  ;;  %v713_v56 = vmul.f32 %v4210_v8, %v677_v19  ;;  %v678_v54 = vmul.f32 %v4205_v7, %v634_v37 }
 0x1be   : > { %v759_v15 = vadd.f32 %v4231_v32, %v723_v31  ;;  %v724_v41 = vmul.f32 %v4210_v8, %v688_v39  ;;  %v725_v40 = vmul.f32 %v4210_v8, %v689_v45  ;;  %v679_v62 = vmul.f32 %v4205_v7, %v635_v52 }
 0x1bf   : > { %v748_v35 = vadd.f32 %v4231_v32, %v712_v46  ;;  %v749_v50 = vadd.f32 %v4231_v32, %v713_v56  ;;  %v714_v10 = vmul.f32 %v4210_v8, %v678_v54  ;;  %v690_v11 = vmul.f32 %v4205_v7, %v646_v16 }
 0x1c0   : > { %v4334_v36 = vpack.c.bf16 %v759_v15, %v758_v34  ;;  %v760_v37 = vadd.f32 %v4231_v32, %v724_v41  ;;  %v761_v33 = vadd.f32 %v4231_v32, %v725_v40  ;;  %v715_v6 = vmul.f32 %v4210_v8, %v679_v62 }
 0x1c1   : > { %3181 = vmatpush.bf16.msrb.mxu1 %v4152_v3  ;;  %v691_v13 = vmul.f32 %v4205_v7, %v647_v21  ;;  %v4344_v18 = vpack.c.bf16 %v749_v50, %v748_v35  ;;  %v750_v52 = vadd.f32 %v4231_v32, %v714_v10  ;;  %v726_v24 = vmul.f32 %v4210_v8, %v690_v11 }
 0x1c2   : > { %v680_v53 = vmul.f32 %v4205_v7, %v636_v60  ;;  %v4349_v29 = vpack.c.bf16 %v761_v33, %v760_v37  ;;  %v751_v3 = vadd.f32 %v4231_v32, %v715_v6  ;;  %v681_v42 = vmul.f32 %v4205_v7, %v637_v59 }
 0x1c3   : > { %v727_v16 = vmul.f32 %v4210_v8, %v691_v13  ;;  %v762_v2 = vadd.f32 %v4231_v32, %v726_v24  ;;  %v692_v14 = vmul.f32 %v4205_v7, %v648_v22  ;;  %v693_v60 = vmul.f32 %v4205_v7, %v649_v9 }
 0x1c4   : > { %v716_v21 = vmul.f32 %v4210_v8, %v680_v53  ;;  %v4365_v31 = vpack.c.bf16 %v751_v3, %v750_v52  ;;  %v717_v19 = vmul.f32 %v4210_v8, %v681_v42  ;;  %v682_v20 = vmul.f32 %v4205_v7, %v638_v57 }
 0x1c5   : > { %3182 = vmatpush.bf16.msrb.mxu1 %v4158_v38  ;;  %v763_v59 = vadd.f32 %v4231_v32, %v727_v16  ;;  %v728_v34 = vmul.f32 %v4210_v8, %v692_v14  ;;  %v729_v1 = vmul.f32 %v4210_v8, %v693_v60  ;;  %v683_v38 = vmul.f32 %v4205_v7, %v639_v0 }
 0x1c6   : > { %v752_v22 = vadd.f32 %v4231_v32, %v716_v21  ;;  %v753_v47 = vadd.f32 %v4231_v32, %v717_v19  ;;  %v718_v57 = vmul.f32 %v4210_v8, %v682_v20  ;;  %v684_v15 = vmul.f32 %v4205_v7, %v640_v23 }
 0x1c7   : > { %963 = vmatmul.bf16.gmra.mxu1 %v4301_v63  ;;  %973 = vmatmul.bf16.gmra.mxu2 %v4306_v26  ;;  %v4382_v9 = vpack.c.bf16 %v763_v59, %v762_v2  ;;  %v764_v46 = vadd.f32 %v4231_v32, %v728_v34  ;;  %v765_v55 = vadd.f32 %v4231_v32, %v729_v1 }
 0x1c8   : > { %1062 = vmatmul.bf16.gmra.mxu3 %v4306_v26  ;;  %1141 = vmatmul.bf16.gmra.mxu0 %v4301_v63  ;;  %v719_v0 = vmul.f32 %v4210_v8, %v683_v38  ;;  %v4392_v39 = vpack.c.bf16 %v753_v47, %v752_v22  ;;  %v754_v45 = vadd.f32 %v4231_v32, %v718_v57 }
 0x1c9   : > { %3183 = vmatpush.bf16.msrb.mxu1 %v4162_v51  ;;  %v685_v56 = vmul.f32 %v4205_v7, %v641_v25  ;;  %v4403_v54 = vpack.c.bf16 %v765_v55, %v764_v46  ;;  %v720_v51 = vmul.f32 %v4210_v8, %v684_v15  ;;  %v706_v61 = vmul.f32 %v4210_v8, %v4294_v28 }
 0x1ca   : > { %v755_v35 = vadd.f32 %v4231_v32, %v719_v0  ;;  %v707_v23 = vmul.f32 %v4210_v8, %v4297_v43  ;;  %v629_v28 = vsub.f32 %v3956_v49, %v4181_v58 }
 0x1cb   : > { %v721_v41 = vmul.f32 %v4210_v8, %v685_v56  ;;  %v756_v12 = vadd.f32 %v4231_v32, %v720_v51  ;;  %v742_v50 = vadd.f32 %v4231_v32, %v706_v61 }
 0x1cc   : > { %v4408_v40 = vpack.c.bf16 %v755_v35, %v754_v45  ;;  %v743_v10 = vadd.f32 %v4231_v32, %v707_v23  ;;  %v673_v37 = vmul.f32 %v4205_v7, %v629_v28 }
 0x1cd   : > { %3184 = vmatpush.bf16.msrb.mxu1 %v4165_v30  ;;  %v757_v25 = vadd.f32 %v4231_v32, %v721_v41  ;;  %v628_v30 = vsub.f32 %v3944_v44, %v4181_v58  ;;  %v814_v58 = vld [vmem:[%s5012_s30] sm:$0x7] }
 0x1ce   : > { %v770_v11 = vpack.c.bf16 %v743_v10, %v742_v50  ;;  %v4465_v53 = vperm.slane %v814_v58, 1 }
 0x1cf   : > { %v4417_v62 = vpack.c.bf16 %v757_v25, %v756_v12  ;;  %v672_v43 = vmul.f32 %v4205_v7, %v628_v30  ;;  %v4457_v7 = vperm.slane %v814_v58, 0 }
 0x1d1   : > { %3185 = vmatpush.bf16.msrb.mxu1 %v4168_v48  ;;  %v708_v48 = vmul.f32 %v4210_v8, %v672_v43 }
 0x1d3   : > { %v744_v33 = vadd.f32 %v4231_v32, %v708_v48 }
 0x1d5   : > { %3186 = vmatpush.bf16.msrb.mxu1 %v4173_v17  ;;  %v709_v17 = vmul.f32 %v4210_v8, %v673_v37  ;;  %v4459_v8 = vperm.slane %v814_v58, 2 }
 0x1d7   : > { %978 = vmatmul.bf16.gmra.mxu2 %v770_v11  ;;  %1047 = vmatmul.bf16.vlgmr.msra.gmra.mxu1 %v4260_v5  ;;  %v745_v5 = vadd.f32 %v4231_v32, %v709_v17 }
 0x1d8   : > { %1067 = vmatmul.bf16.gmra.mxu3 %v770_v11  ;;  %1146 = vmatmul.bf16.gmra.mxu0 %v4262_v27 }
 0x1d9   : > { %v771_v6 = vpack.c.bf16 %v745_v5, %v744_v33 }
 0x1e7   : > { %983 = vmatmul.bf16.gmra.mxu2 %v771_v6  ;;  %1052 = vmatmul.bf16.gmra.mxu1 %v4301_v63 }
 0x1e8   : > { %1072 = vmatmul.bf16.gmra.mxu3 %v771_v6  ;;  %1151 = vmatmul.bf16.gmra.mxu0 %v4306_v26 }
 0x1f7   : > { %988 = vmatmul.bf16.gmra.mxu2 %v4325_v4  ;;  %1196 = vmatmul.bf16.vlgmr.msrb.gmra.mxu1 %v4334_v36 }
 0x1f8   : > { %1077 = vmatmul.bf16.gmra.mxu3 %v4325_v4  ;;  %1156 = vmatmul.bf16.gmra.mxu0 %v770_v11 }
 0x207   : > { %993 = vmatmul.bf16.gmra.mxu2 %v4344_v18  ;;  %1201 = vmatmul.bf16.gmra.mxu1 %v4349_v29 }
 0x208   : > { %1082 = vmatmul.bf16.gmra.mxu3 %v4344_v18  ;;  %1161 = vmatmul.bf16.gmra.mxu0 %v771_v6 }
 0x217   : > { %998 = vmatmul.bf16.gmra.mxu2 %v4365_v31  ;;  %1206 = vmatmul.bf16.gmra.mxu1 %v4382_v9 }
 0x218   : > { %1087 = vmatmul.bf16.gmra.mxu3 %v4365_v31  ;;  %1166 = vmatmul.bf16.gmra.mxu0 %v4325_v4 }
 0x227   : > { %1003 = vmatmul.bf16.gmra.mxu2 %v4392_v39  ;;  %1211 = vmatmul.bf16.gmra.mxu1 %v4403_v54 }
 0x228   : > { %1092 = vmatmul.bf16.gmra.mxu3 %v4392_v39  ;;  %1171 = vmatmul.bf16.gmra.mxu0 %v4344_v18 }
 0x234   : > { %v959_v44 = vpop.f32.mrf.mxu1 }
 0x235   : > { %v1137_v49 = vpop.f32.mrf.mxu0  ;;  %v960_v26 = vadd.f32 %v959_v44, %v4457_v7 }
 0x236   : > { %v1138_v18 = vadd.f32 %v1137_v49, %v4459_v8 }
 0x237   : > { %1008 = vmatmul.bf16.gmra.mxu2 %v4408_v40 }
 0x238   : > { %1097 = vmatmul.bf16.gmra.mxu3 %v4408_v40  ;;  %1176 = vmatmul.bf16.gmra.mxu0 %v4365_v31 }
 0x23a   : > { %v969_v32 = vpop.f32.mrf.mxu2 }
 0x23b   : > { %v1058_v27 = vpop.f32.mrf.mxu3  ;;  %v970_v42 = vadd.f32 %v969_v32, %v4457_v7 }
 0x23c   : > { %v961_v63 = vpop.f32.mrf.mxu1  ;;  %v1059_v14 = vadd.f32 %v1058_v27, %v4465_v53 }
 0x23d   : > { %v962_v4 = vadd.f32 %v961_v63, %v4457_v7  ;;  %v1139_v13 = vpop.f32.mrf.mxu0 }
 0x23e   : > { %v1140_v52 = vadd.f32 %v1139_v13, %v4459_v8 }
 0x23f   : > { %v2881_v24 = vpack.c.bf16 %v962_v4, %v960_v26 }
 0x240   : > { %v3041_v3 = vpack.c.bf16 %v1140_v52, %v1138_v18 }
 0x241   : > { %2882 = vst [vmem:[#allocation2] sm:$0xff] %v2881_v24  }
 0x242   : > { %3042 = vst [vmem:[#allocation4 + $0x28] sm:$0xff] %v3041_v3   ;;  %v971_v16 = vpop.f32.mrf.mxu2 }
 0x243   : > { %v972_v2 = vadd.f32 %v971_v16, %v4457_v7  ;;  %v1060_v21 = vpop.f32.mrf.mxu3 }
 0x244   : > { %v1061_v60 = vadd.f32 %v1060_v21, %v4465_v53  ;;  %v964_v31 = vpop.f32.mrf.mxu1 }
 0x245   : > { %v2891_v59 = vpack.c.bf16 %v972_v2, %v970_v42  ;;  %v1142_v19 = vpop.f32.mrf.mxu0  ;;  %v965_v38 = vadd.f32 %v964_v31, %v4457_v7 }
 0x246   : > { %v2971_v20 = vpack.c.bf16 %v1061_v60, %v1059_v14  ;;  %v1143_v46 = vadd.f32 %v1142_v19, %v4459_v8 }
 0x247   : > { %3119 = vst [vmem:[#allocation2 + $0x10] sm:$0xff] %v2891_v59   ;;  %1013 = vmatmul.bf16.gmra.mxu2 %v4417_v62 }
 0x248   : > { %3134 = vst [vmem:[#allocation3 + $0x58] sm:$0xff] %v2971_v20   ;;  %1102 = vmatmul.bf16.gmra.mxu3 %v4417_v62  ;;  %1181 = vmatmul.bf16.gmra.mxu0 %v4392_v39 }
 0x24a   : > { %v974_v22 = vpop.f32.mrf.mxu2 }
 0x24b   : > { %v1063_v34 = vpop.f32.mrf.mxu3  ;;  %v975_v56 = vadd.f32 %v974_v22, %v4457_v7 }
 0x24c   : > { %v966_v1 = vpop.f32.mrf.mxu1  ;;  %v1064_v51 = vadd.f32 %v1063_v34, %v4465_v53 }
 0x24d   : > { %v967_v47 = vadd.f32 %v966_v1, %v4457_v7  ;;  %v1144_v57 = vpop.f32.mrf.mxu0 }
 0x24e   : > { %v1145_v55 = vadd.f32 %v1144_v57, %v4459_v8 }
 0x24f   : > { %v2886_v0 = vpack.c.bf16 %v967_v47, %v965_v38 }
 0x250   : > { %v3046_v45 = vpack.c.bf16 %v1145_v55, %v1143_v46 }
 0x251   : > { %3118 = vst [vmem:[#allocation2 + $0x8] sm:$0xff] %v2886_v0  }
 0x252   : > { %3148 = vst [vmem:[#allocation4 + $0x68] sm:$0xff] %v3046_v45   ;;  %v976_v15 = vpop.f32.mrf.mxu2 }
 0x253   : > { %v977_v39 = vadd.f32 %v976_v15, %v4457_v7  ;;  %v1065_v35 = vpop.f32.mrf.mxu3 }
 0x254   : > { %v1066_v41 = vadd.f32 %v1065_v35, %v4465_v53  ;;  %v1048_v61 = vpop.f32.mrf.mxu1 }
 0x255   : > { %v2896_v23 = vpack.c.bf16 %v977_v39, %v975_v56  ;;  %v1147_v12 = vpop.f32.mrf.mxu0  ;;  %v1049_v30 = vadd.f32 %v1048_v61, %v4465_v53 }
 0x256   : > { %v2976_v25 = vpack.c.bf16 %v1066_v41, %v1064_v51  ;;  %v1148_v37 = vadd.f32 %v1147_v12, %v4459_v8 }
 0x257   : > { %3120 = vst [vmem:[#allocation2 + $0x18] sm:$0xff] %v2896_v23   ;;  %1018 = vmatmul.bf16.gmra.mxu2 %v4334_v36 }
 0x258   : > { %3135 = vst [vmem:[#allocation3 + $0x18] sm:$0xff] %v2976_v25   ;;  %1107 = vmatmul.bf16.gmra.mxu3 %v4334_v36  ;;  %1186 = vmatmul.bf16.gmra.mxu0 %v4408_v40 }
 0x25a   : > { %v979_v50 = vpop.f32.mrf.mxu2 }
 0x25b   : > { %v1068_v10 = vpop.f32.mrf.mxu3  ;;  %v980_v36 = vadd.f32 %v979_v50, %v4457_v7 }
 0x25c   : > { %v1050_v11 = vpop.f32.mrf.mxu1  ;;  %v1069_v44 = vadd.f32 %v1068_v10, %v4465_v53 }
 0x25d   : > { %v1051_v28 = vadd.f32 %v1050_v11, %v4465_v53  ;;  %v1149_v43 = vpop.f32.mrf.mxu0 }
 0x25e   : > { %v1150_v48 = vadd.f32 %v1149_v43, %v4459_v8 }
 0x25f   : > { %v2961_v17 = vpack.c.bf16 %v1051_v28, %v1049_v30 }
 0x260   : > { %v3051_v33 = vpack.c.bf16 %v1150_v48, %v1148_v37 }
 0x261   : > { %2962 = vst [vmem:[#allocation3 + $0x30] sm:$0xff] %v2961_v17  }
 0x262   : > { %3149 = vst [vmem:[#allocation4 + $0x10] sm:$0xff] %v3051_v33   ;;  %v981_v5 = vpop.f32.mrf.mxu2 }
 0x263   : > { %v982_v40 = vadd.f32 %v981_v5, %v4457_v7  ;;  %v1070_v6 = vpop.f32.mrf.mxu3 }
 0x264   : > { %v1071_v49 = vadd.f32 %v1070_v6, %v4465_v53  ;;  %v1053_v58 = vpop.f32.mrf.mxu1 }
 0x265   : > { %v2901_v32 = vpack.c.bf16 %v982_v40, %v980_v36  ;;  %v1152_v27 = vpop.f32.mrf.mxu0  ;;  %v1054_v18 = vadd.f32 %v1053_v58, %v4465_v53 }
 0x266   : > { %v2981_v63 = vpack.c.bf16 %v1071_v49, %v1069_v44  ;;  %v1153_v3 = vadd.f32 %v1152_v27, %v4459_v8 }
 0x267   : > { %3121 = vst [vmem:[#allocation2 + $0x20] sm:$0xff] %v2901_v32   ;;  %1023 = vmatmul.bf16.gmra.mxu2 %v4349_v29 }
 0x268   : > { %3136 = vst [vmem:[#allocation3 + $0x50] sm:$0xff] %v2981_v63   ;;  %1112 = vmatmul.bf16.gmra.mxu3 %v4349_v29  ;;  %1191 = vmatmul.bf16.gmra.mxu0 %v4417_v62 }
 0x26a   : > { %v984_v26 = vpop.f32.mrf.mxu2 }
 0x26b   : > { %v1073_v4 = vpop.f32.mrf.mxu3  ;;  %v985_v29 = vadd.f32 %v984_v26, %v4457_v7 }
 0x26c   : > { %v1055_v13 = vpop.f32.mrf.mxu1  ;;  %v1074_v60 = vadd.f32 %v1073_v4, %v4465_v53 }
 0x26d   : > { %v1056_v52 = vadd.f32 %v1055_v13, %v4465_v53  ;;  %v1154_v24 = vpop.f32.mrf.mxu0 }
 0x26e   : > { %v1155_v16 = vadd.f32 %v1154_v24, %v4459_v8 }
 0x26f   : > { %v2966_v42 = vpack.c.bf16 %v1056_v52, %v1054_v18 }
 0x270   : > { %v3056_v2 = vpack.c.bf16 %v1155_v16, %v1153_v3 }
 0x271   : > { %3133 = vst [vmem:[#allocation3] sm:$0xff] %v2966_v42  }
 0x272   : > { %3150 = vst [vmem:[#allocation4 + $0x40] sm:$0xff] %v3056_v2   ;;  %v986_v21 = vpop.f32.mrf.mxu2 }
 0x273   : > { %v987_v62 = vadd.f32 %v986_v21, %v4457_v7  ;;  %v1075_v14 = vpop.f32.mrf.mxu3 }
 0x274   : > { %v1076_v31 = vadd.f32 %v1075_v14, %v4465_v53  ;;  %v1197_v59 = vpop.f32.mrf.mxu1 }
 0x275   : > { %v2906_v19 = vpack.c.bf16 %v987_v62, %v985_v29  ;;  %v1157_v20 = vpop.f32.mrf.mxu0  ;;  %v1198_v47 = vadd.f32 %v1197_v59, %v4459_v8 }
 0x276   : > { %v2986_v22 = vpack.c.bf16 %v1076_v31, %v1074_v60  ;;  %v1158_v55 = vadd.f32 %v1157_v20, %v4459_v8 }
 0x277   : > { %3122 = vst [vmem:[#allocation2 + $0x28] sm:$0xff] %v2906_v19   ;;  %1028 = vmatmul.bf16.gmra.mxu2 %v4382_v9 }
 0x278   : > { %3137 = vst [vmem:[#allocation3 + $0x68] sm:$0xff] %v2986_v22   ;;  %1117 = vmatmul.bf16.gmra.mxu3 %v4382_v9 }
 0x27a   : > { %v989_v34 = vpop.f32.mrf.mxu2 }
 0x27b   : > { %v1078_v1 = vpop.f32.mrf.mxu3  ;;  %v990_v39 = vadd.f32 %v989_v34, %v4457_v7 }
 0x27c   : > { %v1199_v38 = vpop.f32.mrf.mxu1  ;;  %v1079_v51 = vadd.f32 %v1078_v1, %v4465_v53 }
 0x27d   : > { %v1159_v57 = vpop.f32.mrf.mxu0  ;;  %v1200_v46 = vadd.f32 %v1199_v38, %v4459_v8 }
 0x27e   : > { %v1160_v0 = vadd.f32 %v1159_v57, %v4459_v8 }
 0x27f   : > { %v3101_v45 = vpack.c.bf16 %v1200_v46, %v1198_v47 }
 0x280   : > { %v3061_v15 = vpack.c.bf16 %v1160_v0, %v1158_v55 }
 0x281   : > { %3159 = vst [vmem:[#allocation4] sm:$0xff] %v3101_v45  }
 0x282   : > { %3151 = vst [vmem:[#allocation4 + $0x48] sm:$0xff] %v3061_v15   ;;  %v991_v56 = vpop.f32.mrf.mxu2 }
 0x283   : > { %v992_v9 = vadd.f32 %v991_v56, %v4457_v7  ;;  %v1080_v35 = vpop.f32.mrf.mxu3 }
 0x284   : > { %v1081_v41 = vadd.f32 %v1080_v35, %v4465_v53  ;;  %v1202_v61 = vpop.f32.mrf.mxu1 }
 0x285   : > { %v2911_v23 = vpack.c.bf16 %v992_v9, %v990_v39  ;;  %v1162_v12 = vpop.f32.mrf.mxu0  ;;  %v1203_v30 = vadd.f32 %v1202_v61, %v4459_v8 }
 0x286   : > { %v2991_v25 = vpack.c.bf16 %v1081_v41, %v1079_v51  ;;  %v1163_v37 = vadd.f32 %v1162_v12, %v4459_v8 }
 0x287   : > { %3123 = vst [vmem:[#allocation2 + $0x30] sm:$0xff] %v2911_v23   ;;  %1033 = vmatmul.bf16.gmra.mxu2 %v4403_v54 }
 0x288   : > { %3138 = vst [vmem:[#allocation3 + $0x8] sm:$0xff] %v2991_v25   ;;  %1122 = vmatmul.bf16.gmra.mxu3 %v4403_v54 }
 0x28a   : > { %v994_v50 = vpop.f32.mrf.mxu2 }
 0x28b   : > { %v1083_v10 = vpop.f32.mrf.mxu3  ;;  %v995_v36 = vadd.f32 %v994_v50, %v4457_v7 }
 0x28c   : > { %v1204_v11 = vpop.f32.mrf.mxu1  ;;  %v1084_v6 = vadd.f32 %v1083_v10, %v4465_v53 }
 0x28d   : > { %v1164_v28 = vpop.f32.mrf.mxu0  ;;  %v1205_v43 = vadd.f32 %v1204_v11, %v4459_v8 }
 0x28e   : > { %v1165_v48 = vadd.f32 %v1164_v28, %v4459_v8 }
 0x28f   : > { %v3106_v17 = vpack.c.bf16 %v1205_v43, %v1203_v30 }
 0x290   : > { %v3066_v33 = vpack.c.bf16 %v1165_v48, %v1163_v37 }
 0x291   : > { %3160 = vst [vmem:[#allocation4 + $0x8] sm:$0xff] %v3106_v17  }
 0x292   : > { %3152 = vst [vmem:[#allocation4 + $0x30] sm:$0xff] %v3066_v33   ;;  %v996_v5 = vpop.f32.mrf.mxu2 }
 0x293   : > { %v997_v54 = vadd.f32 %v996_v5, %v4457_v7  ;;  %v1085_v40 = vpop.f32.mrf.mxu3 }
 0x294   : > { %v1086_v44 = vadd.f32 %v1085_v40, %v4465_v53  ;;  %v1207_v49 = vpop.f32.mrf.mxu1 }
 0x295   : > { %v2916_v58 = vpack.c.bf16 %v997_v54, %v995_v36  ;;  %v1167_v32 = vpop.f32.mrf.mxu0  ;;  %v1208_v13 = vadd.f32 %v1207_v49, %v4459_v8 }
 0x296   : > { %v2996_v27 = vpack.c.bf16 %v1086_v44, %v1084_v6  ;;  %v1168_v24 = vadd.f32 %v1167_v32, %v4459_v8 }
 0x297   : > { %3124 = vst [vmem:[#allocation2 + $0x38] sm:$0xff] %v2916_v58  }
 0x298   : > { %3139 = vst [vmem:[#allocation3 + $0x48] sm:$0xff] %v2996_v27  }
 0x29a   : > { %v999_v63 = vpop.f32.mrf.mxu2 }
 0x29b   : > { %v1088_v26 = vpop.f32.mrf.mxu3  ;;  %v1000_v21 = vadd.f32 %v999_v63, %v4457_v7 }
 0x29c   : > { %v1209_v4 = vpop.f32.mrf.mxu1  ;;  %v1089_v14 = vadd.f32 %v1088_v26, %v4465_v53 }
 0x29d   : > { %v1169_v18 = vpop.f32.mrf.mxu0  ;;  %v1210_v52 = vadd.f32 %v1209_v4, %v4459_v8 }
 0x29e   : > { %v1170_v3 = vadd.f32 %v1169_v18, %v4459_v8 }
 0x29f   : > { %v3111_v16 = vpack.c.bf16 %v1210_v52, %v1208_v13 }
 0x2a0   : > { %v3071_v42 = vpack.c.bf16 %v1170_v3, %v1168_v24 }
 0x2a1   : > { %3161 = vst [vmem:[#allocation4 + $0x60] sm:$0xff] %v3111_v16  }
 0x2a2   : > { %3153 = vst [vmem:[#allocation4 + $0x70] sm:$0xff] %v3071_v42   ;;  %v1001_v2 = vpop.f32.mrf.mxu2 }
 0x2a3   : > { %v1002_v29 = vadd.f32 %v1001_v2, %v4457_v7  ;;  %v1090_v62 = vpop.f32.mrf.mxu3 }
 0x2a4   : > { %v1091_v60 = vadd.f32 %v1090_v62, %v4465_v53  ;;  %v1212_v31 = vpop.f32.mrf.mxu1 }
 0x2a5   : > { %v2921_v59 = vpack.c.bf16 %v1002_v29, %v1000_v21  ;;  %v1172_v19 = vpop.f32.mrf.mxu0  ;;  %v1213_v38 = vadd.f32 %v1212_v31, %v4459_v8 }
 0x2a6   : > { %v3001_v20 = vpack.c.bf16 %v1091_v60, %v1089_v14  ;;  %v1173_v46 = vadd.f32 %v1172_v19, %v4459_v8 }
 0x2a7   : > { %3125 = vst [vmem:[#allocation2 + $0x40] sm:$0xff] %v2921_v59  }
 0x2a8   : > { %3140 = vst [vmem:[#allocation3 + $0x40] sm:$0xff] %v3001_v20  }
 0x2aa   : > { %v1004_v22 = vpop.f32.mrf.mxu2 }
 0x2ab   : > { %v1093_v34 = vpop.f32.mrf.mxu3  ;;  %v1005_v56 = vadd.f32 %v1004_v22, %v4457_v7 }
 0x2ac   : > { %v1214_v1 = vpop.f32.mrf.mxu1  ;;  %v1094_v35 = vadd.f32 %v1093_v34, %v4465_v53 }
 0x2ad   : > { %v1174_v47 = vpop.f32.mrf.mxu0  ;;  %v1215_v57 = vadd.f32 %v1214_v1, %v4459_v8 }
 0x2ae   : > { %v1175_v55 = vadd.f32 %v1174_v47, %v4459_v8 }
 0x2af   : > { %v3116_v0 = vpack.c.bf16 %v1215_v57, %v1213_v38 }
 0x2b0   : > { %v3076_v45 = vpack.c.bf16 %v1175_v55, %v1173_v46 }
 0x2b1   : > { %3162 = vst [vmem:[#allocation4 + $0x50] sm:$0xff] %v3116_v0  }
 0x2b2   : > { %3154 = vst [vmem:[#allocation4 + $0x38] sm:$0xff] %v3076_v45   ;;  %v1006_v15 = vpop.f32.mrf.mxu2 }
 0x2b3   : > { %v1007_v39 = vadd.f32 %v1006_v15, %v4457_v7  ;;  %v1095_v9 = vpop.f32.mrf.mxu3 }
 0x2b4   : > { %v1096_v51 = vadd.f32 %v1095_v9, %v4465_v53 }
 0x2b5   : > { %v2926_v41 = vpack.c.bf16 %v1007_v39, %v1005_v56  ;;  %v1177_v61 = vpop.f32.mrf.mxu0 }
 0x2b6   : > { %v3006_v23 = vpack.c.bf16 %v1096_v51, %v1094_v35  ;;  %v1178_v10 = vadd.f32 %v1177_v61, %v4459_v8 }
 0x2b7   : > { %3126 = vst [vmem:[#allocation2 + $0x48] sm:$0xff] %v2926_v41  }
 0x2b8   : > { %3141 = vst [vmem:[#allocation3 + $0x20] sm:$0xff] %v3006_v23  }
 0x2ba   : > { %v1009_v12 = vpop.f32.mrf.mxu2 }
 0x2bb   : > { %v1098_v25 = vpop.f32.mrf.mxu3  ;;  %v1010_v43 = vadd.f32 %v1009_v12, %v4457_v7 }
 0x2bc   : > { %v1099_v17 = vadd.f32 %v1098_v25, %v4465_v53 }
 0x2bd   : > { %v1179_v50 = vpop.f32.mrf.mxu0 }
 0x2be   : > { %v1180_v11 = vadd.f32 %v1179_v50, %v4459_v8 }
 0x2c0   : > { %v3081_v30 = vpack.c.bf16 %v1180_v11, %v1178_v10 }
 0x2c2   : > { %3155 = vst [vmem:[#allocation4 + $0x20] sm:$0xff] %v3081_v30   ;;  %v1011_v28 = vpop.f32.mrf.mxu2 }
 0x2c3   : > { %v1012_v37 = vadd.f32 %v1011_v28, %v4457_v7  ;;  %v1100_v48 = vpop.f32.mrf.mxu3 }
 0x2c4   : > { %v1101_v33 = vadd.f32 %v1100_v48, %v4465_v53 }
 0x2c5   : > { %v2931_v5 = vpack.c.bf16 %v1012_v37, %v1010_v43  ;;  %v1182_v36 = vpop.f32.mrf.mxu0 }
 0x2c6   : > { %v3011_v54 = vpack.c.bf16 %v1101_v33, %v1099_v17  ;;  %v1183_v49 = vadd.f32 %v1182_v36, %v4459_v8 }
 0x2c7   : > { %3127 = vst [vmem:[#allocation2 + $0x50] sm:$0xff] %v2931_v5  }
 0x2c8   : > { %3142 = vst [vmem:[#allocation3 + $0x10] sm:$0xff] %v3011_v54  }
 0x2ca   : > { %v1014_v40 = vpop.f32.mrf.mxu2 }
 0x2cb   : > { %v1103_v6 = vpop.f32.mrf.mxu3  ;;  %v1015_v63 = vadd.f32 %v1014_v40, %v4457_v7 }
 0x2cc   : > { %v1104_v13 = vadd.f32 %v1103_v6, %v4465_v53 }
 0x2cd   : > { %v1184_v44 = vpop.f32.mrf.mxu0 }
 0x2ce   : > { %v1185_v58 = vadd.f32 %v1184_v44, %v4459_v8 }
 0x2d0   : > { %v3086_v32 = vpack.c.bf16 %v1185_v58, %v1183_v49 }
 0x2d2   : > { %3156 = vst [vmem:[#allocation4 + $0x78] sm:$0xff] %v3086_v32   ;;  %v1016_v27 = vpop.f32.mrf.mxu2 }
 0x2d3   : > { %v1017_v26 = vadd.f32 %v1016_v27, %v4457_v7  ;;  %v1105_v4 = vpop.f32.mrf.mxu3 }
 0x2d4   : > { %v1106_v18 = vadd.f32 %v1105_v4, %v4465_v53 }
 0x2d5   : > { %v2936_v52 = vpack.c.bf16 %v1017_v26, %v1015_v63  ;;  %v1187_v24 = vpop.f32.mrf.mxu0 }
 0x2d6   : > { %v3016_v3 = vpack.c.bf16 %v1106_v18, %v1104_v13  ;;  %v1188_v21 = vadd.f32 %v1187_v24, %v4459_v8 }
 0x2d7   : > { %3128 = vst [vmem:[#allocation2 + $0x58] sm:$0xff] %v2936_v52  }
 0x2d8   : > { %3143 = vst [vmem:[#allocation3 + $0x38] sm:$0xff] %v3016_v3  }
 0x2da   : > { %v1019_v16 = vpop.f32.mrf.mxu2 }
 0x2db   : > { %v1108_v42 = vpop.f32.mrf.mxu3  ;;  %v1020_v60 = vadd.f32 %v1019_v16, %v4457_v7 }
 0x2dc   : > { %v1109_v19 = vadd.f32 %v1108_v42, %v4465_v53 }
 0x2dd   : > { %v1189_v2 = vpop.f32.mrf.mxu0 }
 0x2de   : > { %v1190_v29 = vadd.f32 %v1189_v2, %v4459_v8 }
 0x2e0   : > { %v3091_v62 = vpack.c.bf16 %v1190_v29, %v1188_v21 }
 0x2e2   : > { %3157 = vst [vmem:[#allocation4 + $0x18] sm:$0xff] %v3091_v62   ;;  %v1021_v14 = vpop.f32.mrf.mxu2 }
 0x2e3   : > { %v1022_v31 = vadd.f32 %v1021_v14, %v4457_v7  ;;  %v1110_v59 = vpop.f32.mrf.mxu3 }
 0x2e4   : > { %v1111_v20 = vadd.f32 %v1110_v59, %v4465_v53 }
 0x2e5   : > { %v2941_v22 = vpack.c.bf16 %v1022_v31, %v1020_v60  ;;  %v1192_v34 = vpop.f32.mrf.mxu0 }
 0x2e6   : > { %v3021_v1 = vpack.c.bf16 %v1111_v20, %v1109_v19  ;;  %v1193_v46 = vadd.f32 %v1192_v34, %v4459_v8 }
 0x2e7   : > { %3129 = vst [vmem:[#allocation2 + $0x60] sm:$0xff] %v2941_v22  }
 0x2e8   : > { %3144 = vst [vmem:[#allocation3 + $0x60] sm:$0xff] %v3021_v1  }
 0x2ea   : > { %v1024_v38 = vpop.f32.mrf.mxu2 }
 0x2eb   : > { %v1113_v47 = vpop.f32.mrf.mxu3  ;;  %v1025_v15 = vadd.f32 %v1024_v38, %v4457_v7 }
 0x2ec   : > { %v1114_v9 = vadd.f32 %v1113_v47, %v4465_v53 }
 0x2ed   : > { %v1194_v57 = vpop.f32.mrf.mxu0 }
 0x2ee   : > { %v1195_v55 = vadd.f32 %v1194_v57, %v4459_v8 }
 0x2f0   : > { %v3096_v0 = vpack.c.bf16 %v1195_v55, %v1193_v46 }
 0x2f2   : > { %3158 = vst [vmem:[#allocation4 + $0x58] sm:$0xff] %v3096_v0   ;;  %v1026_v45 = vpop.f32.mrf.mxu2 }
 0x2f3   : > { %v1027_v56 = vadd.f32 %v1026_v45, %v4457_v7  ;;  %v1115_v39 = vpop.f32.mrf.mxu3 }
 0x2f4   : > { %v1116_v35 = vadd.f32 %v1115_v39, %v4465_v53 }
 0x2f5   : > { %v2946_v51 = vpack.c.bf16 %v1027_v56, %v1025_v15 }
 0x2f6   : > { %v3026_v41 = vpack.c.bf16 %v1116_v35, %v1114_v9 }
 0x2f7   : > { %3130 = vst [vmem:[#allocation2 + $0x68] sm:$0xff] %v2946_v51  }
 0x2f8   : > { %3145 = vst [vmem:[#allocation3 + $0x70] sm:$0xff] %v3026_v41  }
 0x2fa   : > { %v1029_v61 = vpop.f32.mrf.mxu2 }
 0x2fb   : > { %v1118_v23 = vpop.f32.mrf.mxu3  ;;  %v1030_v8 = vadd.f32 %v1029_v61, %v4457_v7 }
 0x2fc   : > { %v1119_v10 = vadd.f32 %v1118_v23, %v4465_v53 }
 0x302   : > { %v1031_v12 = vpop.f32.mrf.mxu2 }
 0x303   : > { %v1032_v25 = vadd.f32 %v1031_v12, %v4457_v7  ;;  %v1120_v50 = vpop.f32.mrf.mxu3 }
 0x304   : > { %v1121_v11 = vadd.f32 %v1120_v50, %v4465_v53 }
 0x305   : > { %v2951_v30 = vpack.c.bf16 %v1032_v25, %v1030_v8 }
 0x306   : > { %v3031_v28 = vpack.c.bf16 %v1121_v11, %v1119_v10 }
 0x307   : > { %3131 = vst [vmem:[#allocation2 + $0x70] sm:$0xff] %v2951_v30  }
 0x308   : > { %3146 = vst [vmem:[#allocation3 + $0x78] sm:$0xff] %v3031_v28  }
 0x30a   : > { %v1034_v43 = vpop.f32.mrf.mxu2 }
 0x30b   : > { %v1123_v37 = vpop.f32.mrf.mxu3  ;;  %v1035_v17 = vadd.f32 %v1034_v43, %v4457_v7 }
 0x30c   : > { %v1124_v36 = vadd.f32 %v1123_v37, %v4465_v53 }
 0x312   : > { %v1036_v48 = vpop.f32.mrf.mxu2 }
 0x313   : > { %v1037_v33 = vadd.f32 %v1036_v48, %v4457_v7  ;;  %v1125_v5 = vpop.f32.mrf.mxu3 }
 0x314   : > { %v1126_v54 = vadd.f32 %v1125_v5, %v4465_v53 }
 0x315   : > { %v2956_v40 = vpack.c.bf16 %v1037_v33, %v1035_v17 }
 0x316   : > { %v3036_v6 = vpack.c.bf16 %v1126_v54, %v1124_v36 }
 0x317   : > { %3132 = vst [vmem:[#allocation2 + $0x78] sm:$0xff] %v2956_v40  }
 0x318   : > { %3147 = vst [vmem:[#allocation3 + $0x28] sm:$0xff] %v3036_v6  }
 0x319 PF: > { %v2845_v44 = vld [vmem:[#allocation3 + $0x48] sm:$0xff]  ;;  %v2852_v32 = vld [vmem:[#allocation3 + $0x78] sm:$0xff]  ;;  %v2851_v7 = vld [vmem:[#allocation3 + $0x70] sm:$0xff]  ;;  %s2605_s16 = sshll.u32 %s3601_s11, 7  ;;  %s5013_s20 = sld [smem:[#allocation24_spill]] }
 0x31a   : > { %1606 = vmatpush.bf16.xpose.msra.mxu0 %v2845_v44  ;;  %v2844_v58 = vld [vmem:[#allocation3 + $0x8] sm:$0xff]  ;;  %v2842_v63 = vld [vmem:[#allocation3 + $0x50] sm:$0xff]  ;;  %v2850_v53 = vld [vmem:[#allocation3 + $0x60] sm:$0xff]  ;;  %s1410_s17 = sshra.s32 %s2605_s16, 3  ;;  %s5014_s22 = sld [smem:[#allocation25_spill]] }
 0x31b   : > { %v2843_v27 = vld [vmem:[#allocation3 + $0x68] sm:$0xff]  ;;  %v2841_v26 = vld [vmem:[#allocation3 + $0x18] sm:$0xff]  ;;  %v2848_v18 = vld [vmem:[#allocation3 + $0x10] sm:$0xff]  ;;  %s2606_s21 = sshll.u32 %s1410_s17, 2  ;;  %s4862_s18 = scalar_lea.vmem %s3801_s23, %s2605_s16 [#allocation5] }
 0x31c   : > { %v2849_v4 = vld [vmem:[#allocation3 + $0x38] sm:$0xff]  ;;  %v2839_v52 = vld [vmem:[#allocation3] sm:$0xff]  ;;  %v2838_v3 = vld [vmem:[#allocation3 + $0x30] sm:$0xff]  ;;  %s1413_s27 = scalar_lea.vmem [#allocation2], %s2606_s21  ;;  %s5015_s23 = sld [smem:[#allocation15_spill]] }
 0x31d   : > { %v2840_v13 = vld [vmem:[#allocation3 + $0x58] sm:$0xff]  ;;  %v2847_v24 = vld [vmem:[#allocation3 + $0x20] sm:$0xff]  ;;  %s2800_s16 = sshll.u32 %s3601_s11, 4  ;;  %s5016_s17 = sld [smem:[#allocation26_spill]] }
 0x31e   : > { %v2846_v16 = vld [vmem:[#allocation3 + $0x40] sm:$0xff]  ;;  %v2831_v2 = vld [vmem:[%s1413_s27 + $0x8] sm:$0xff]  ;;  %v2832_v21 = vld [vmem:[%s1413_s27 + $0x10] sm:$0xff]  ;;  %s2375_s4 = sshll.u32 %s3814_s6, 4  ;;  %s2361_s11 = scalar_lea.sflag [#allocation7], %s354_s3  ;;  %s2376_s4 = int_to_ptr.vmem [resolvable:$true] %s2375_s4 }
 0x31f   : > { %v2853_v49 = vld [vmem:[#allocation3 + $0x28] sm:$0xff]  ;;  %v2830_v42 = vld [vmem:[%s1413_s27] sm:$0xff]  ;;  %v2833_v29 = vld [vmem:[%s1413_s27 + $0x18] sm:$0xff] }
 0x320   : > { %1655 = vmatpush.bf16.xpose.msra.mxu1 %v2853_v49  ;;  %v2834_v62 = vld [vmem:[%s1413_s27 + $0x20] sm:$0xff]  ;;  %v2835_v14 = vld [vmem:[%s1413_s27 + $0x28] sm:$0xff]  ;;  %v2836_v60 = vld [vmem:[%s1413_s27 + $0x30] sm:$0xff] }
 0x321   : > { %v2837_v31 = vld [vmem:[%s1413_s27 + $0x38] sm:$0xff] }
 0x322   : > { %1607 = vmatpush.bf16.xpose.msra.mxu0 %v2844_v58  ;;  %s2801_s19 = sshll.u32 %s5015_s23, 5 }
 0x323   : > { %s2372_s24 = sadd.s32 %s2801_s19, %s2800_s16  ;;  %s3511_s16 = scalar_lea.hbm %s5016_s17, 512 }
 0x324   : > { %s2802_s26 = sshll.u32 %s2372_s24, 3 }
 0x325   : > { %s2374_s21 = scalar_lea.hbm %s5016_s17, %s2802_s26 }
 0x326   : > { %s2377_s13 = sshll.u32 %s2374_s21, 4  ;;  %s2378_s13 = int_to_ptr.hbm [resolvable:$true] %s2377_s13 }
 0x327   : > { %s3505_s5 = sshra.s32 %s2378_s13, 4  ;;  %s3506_s5 = int_to_ptr.hbm [resolvable:$true] %s3505_s5 }
 0x328   : > { %1656 = vmatpush.bf16.xpose.msra.mxu1 %v2852_v32  ;;  %s3507_s7 = scalar_lea.hbm %s3506_s5, 128  ;;  %p3512_p2 = scmp.lt.s32.totalorder %s3506_s5, %s5016_s17 }
 0x329   : > { %p3508_p1 = scmp.ne.s32.totalorder %s3506_s5, %s3507_s7  ;;  %p3513_p3 = scmp.lt.s32.totalorder %s3511_s16, %s3507_s7 }
 0x32a   : > { %1608 = vmatpush.bf16.xpose.msra.mxu0 %v2843_v27 }
 0x32b   : > { %p3509_p4 = pnand %p3508_p1, %p3741_p6  ;;  %p3514_p5 = por %p3513_p3, %p3512_p2 }
 0x32d   : > { %p3510_p0 = pneg %p3509_p4 }
 0x32f   : > { %p3515_p7 = pnand %p3514_p5, %p3510_p0 }
 0x330   : > { %1657 = vmatpush.bf16.xpose.msra.mxu1 %v2851_v7 }
 0x332   : > { %1609 = vmatpush.bf16.xpose.msra.mxu0 %v2842_v63 }
 0x338   : > { %1658 = vmatpush.bf16.xpose.msra.mxu1 %v2850_v53 }
 0x33a   : > { %1610 = vmatpush.bf16.xpose.msra.mxu0 %v2841_v26 }
 0x340   : > { %1659 = vmatpush.bf16.xpose.msra.mxu1 %v2849_v4 }
 0x342   : > { %1611 = vmatpush.bf16.xpose.msra.mxu0 %v2840_v13 }
 0x348   : > { %1660 = vmatpush.bf16.xpose.msra.mxu1 %v2848_v18 }
 0x34a   : > { %1612 = vmatpush.bf16.xpose.msra.mxu0 %v2839_v52 }
 0x350   : > { %1661 = vmatpush.bf16.xpose.msra.mxu1 %v2847_v24 }
 0x352   : > { %1613 = vmatpush.bf16.xpose.msra.mxu0 %v2838_v3 }
 0x358   : > { %1662 = vmatpush.bf16.xpose.msra.mxu1 %v2846_v16 }
 0x359   : > { %1614 = vmatmul.bf16.vlgmr.msra.gmra.mxu0 %v2830_v42 }
 0x35f   : > { %1663 = vmatmul.bf16.vlgmr.msra.gmra.mxu1 %v2830_v42 }
 0x369   : > { %1619 = vmatmul.bf16.gmra.mxu0 %v2831_v2 }
 0x36f   : > { %1668 = vmatmul.bf16.gmra.mxu1 %v2831_v2 }
 0x379   : > { %1624 = vmatmul.bf16.gmra.mxu0 %v2832_v21 }
 0x37f   : > { %1673 = vmatmul.bf16.gmra.mxu1 %v2832_v21 }
 0x389   : > { %1629 = vmatmul.bf16.gmra.mxu0 %v2833_v29 }
 0x38f   : > { %1678 = vmatmul.bf16.gmra.mxu1 %v2833_v29 }
 0x399   : > { %1634 = vmatmul.bf16.gmra.mxu0 %v2834_v62 }
 0x39f   : > { %1683 = vmatmul.bf16.gmra.mxu1 %v2834_v62 }
 0x3a9   : > { %1639 = vmatmul.bf16.gmra.mxu0 %v2835_v14 }
 0x3af   : > { %1688 = vmatmul.bf16.gmra.mxu1 %v2835_v14 }
 0x3b9   : > { %1644 = vmatmul.bf16.gmra.mxu0 %v2836_v60 }
 0x3bf   : > { %1693 = vmatmul.bf16.gmra.mxu1 %v2836_v60 }
 0x3c9   : > { %1649 = vmatmul.bf16.gmra.mxu0 %v2837_v31 }
 0x3cf   : > { %1698 = vmatmul.bf16.gmra.mxu1 %v2837_v31 }
 0x3d6   : > { %v4575_v59 = vpop.f32.mrf.mxu0 }
 0x3dc   : > { %v4577_v19 = vpop.f32.mrf.mxu1 }
 0x3dd   : > { %v1704_v30 = vmax.f32 %v4575_v59, %v4577_v19 }
 0x3de   : > { %v4579_v20 = vpop.f32.mrf.mxu0 }
 0x3e4   : > { %v4581_v22 = vpop.f32.mrf.mxu1 }
 0x3e5   : > { %v1707_v5 = vmax.f32 %v4579_v20, %v4581_v22 }
 0x3e6   : > { %v4583_v34 = vpop.f32.mrf.mxu0 }
 0x3ec   : > { %v4585_v1 = vpop.f32.mrf.mxu1 }
 0x3ed   : > { %v1710_v6 = vmax.f32 %v4583_v34, %v4585_v1 }
 0x3ee   : > { %v4587_v38 = vpop.f32.mrf.mxu0 }
 0x3f4   : > { %v4589_v47 = vpop.f32.mrf.mxu1 }
 0x3f5   : > { %v1713_v60 = vmax.f32 %v4587_v38, %v4589_v47 }
 0x3f6   : > { %v4591_v57 = vpop.f32.mrf.mxu0 }
 0x3fc   : > { %v4593_v46 = vpop.f32.mrf.mxu1 }
 0x3fe   : > { %v4595_v55 = vpop.f32.mrf.mxu0 }
 0x404   : > { %v4597_v0 = vpop.f32.mrf.mxu1 }
 0x406   : > { %v4599_v45 = vpop.f32.mrf.mxu0 }
 0x40c   : > { %v4601_v15 = vpop.f32.mrf.mxu1 }
 0x40e   : > { %v4603_v56 = vpop.f32.mrf.mxu0 }
 0x414   : > { %v4605_v39 = vpop.f32.mrf.mxu1 }
 0x416   : > { %v4607_v9 = vpop.f32.mrf.mxu0 }
 0x41c   : > { %v4609_v35 = vpop.f32.mrf.mxu1 }
 0x41e   : > { %v4611_v51 = vpop.f32.mrf.mxu0 }
 0x424   : > { %v4613_v41 = vpop.f32.mrf.mxu1 }
 0x426   : > { %v1640_v61 = vpop.f32.mrf.mxu0 }
 0x42c   : > { %v1689_v23 = vpop.f32.mrf.mxu1 }
 0x42d   : > { %v1734_v12 = vmax.f32 %v1640_v61, %v1689_v23 }
 0x42e   : > { %v1642_v8 = vpop.f32.mrf.mxu0 }
 0x42f   : > { %1735 = vmax.xlane.f32.xlu0 %v1734_v12 }
 0x434   : > { %v1691_v25 = vpop.f32.mrf.mxu1 }
 0x435   : > { %v1737_v50 = vmax.f32 %v1642_v8, %v1691_v25 }
 0x436   : > { %v1645_v10 = vpop.f32.mrf.mxu0 }
 0x437   : > { %1738 = vmax.xlane.f32.xlu0 %v1737_v50  ;;  %v1716_v50 = vmax.f32 %v4591_v57, %v4593_v46 }
 0x43c   : > { %v1694_v11 = vpop.f32.mrf.mxu1 }
 0x43d   : > { %v1740_v28 = vmax.f32 %v1645_v10, %v1694_v11 }
 0x43e   : > { %v1647_v43 = vpop.f32.mrf.mxu0 }
 0x43f   : > { %1705 = vmax.xlane.f32.xlu0 %v1704_v30  ;;  %1741 = vmax.xlane.f32.xlu1 %v1740_v28 }
 0x444   : > { %v1696_v37 = vpop.f32.mrf.mxu1 }
 0x445   : > { %v1743_v48 = vmax.f32 %v1647_v43, %v1696_v37 }
 0x446   : > { %v1650_v17 = vpop.f32.mrf.mxu0 }
 0x447   : > { %1744 = vmax.xlane.f32.xlu1 %v1743_v48 }
 0x44c   : > { %v1699_v33 = vpop.f32.mrf.mxu1 }
 0x44d   : > { %v1746_v36 = vmax.f32 %v1650_v17, %v1699_v33 }
 0x44e   : > { %v4619_v54 = vpop.f32.mrf.mxu0 }
 0x44f   : > { %1708 = vmax.xlane.f32.xlu1 %v1707_v5  ;;  %1747 = vmax.xlane.f32.xlu2 %v1746_v36 }
 0x454   : > { %v4621_v40 = vpop.f32.mrf.mxu1 }
 0x455   : > { %v1749_v44 = vmax.f32 %v4619_v54, %v4621_v40 }
 0x457   : > { %1711 = vmax.xlane.f32.xlu1 %v1710_v6  ;;  %1750 = vmax.xlane.f32.xlu2 %v1749_v44 }
 0x4a2   : > { %v1736_v49 = vpop.xlane.xlu0 %1735 }
 0x4a3   : > { %v1772_v58 = vsub.f32 %v1640_v61, %v1736_v49  ;;  %v1773_v32 = vsub.f32 %v1689_v23, %v1736_v49 }
 0x4a5   : > { %v1824_v27 = vmul.f32 1.442695, %v1772_v58  ;;  %v1826_v7 = vmul.f32 1.442695, %v1773_v32  ;;  %v1719_v32 = vmax.f32 %v4595_v55, %v4597_v0 }
 0x4a7   : > { %3335 = vpow2.f32 %v1824_v27 }
 0x4a8   : > { %3337 = vpow2.f32 %v1826_v7 }
 0x4aa   : > { %v1739_v63 = vpop.xlane.xlu0 %1738 }
 0x4ab   : > { %v1774_v53 = vsub.f32 %v1642_v8, %v1739_v63  ;;  %v1775_v26 = vsub.f32 %v1691_v25, %v1739_v63 }
 0x4ad   : > { %v4627_v4 = vpop.eup %3335  ;;  %v1828_v13 = vmul.f32 1.442695, %v1774_v53  ;;  %v1830_v18 = vmul.f32 1.442695, %v1775_v26  ;;  %v2861_v26 = vld [vmem:[#allocation4 + $0x38] sm:$0xff] }
 0x4ae   : > { %v4629_v52 = vpop.eup %3337  ;;  %3189 = vmatpush.bf16.msra.mxu3 %v2861_v26  ;;  %2088 = vmatpush.bf16.msrb.mxu0 %v2861_v26 }
 0x4af   : > { %3339 = vpow2.f32 %v1828_v13  ;;  %v1878_v24 = vadd.f32 %v4629_v52, %v4627_v4  ;;  %3187 = vmatpush.bf16.msrb.mxu1 %v2861_v26  ;;  %3188 = vmatpush.bf16.msra.mxu2 %v2861_v26 }
 0x4b0   : > { %3341 = vpow2.f32 %v1830_v18 }
 0x4b1   : > { %1879 = vadd.xlane.f32.xlu2 %v1878_v24  ;;  %v2860_v24 = vld [vmem:[#allocation4 + $0x70] sm:$0xff] }
 0x4b2   : > { %v1742_v3 = vpop.xlane.xlu1 %1741  ;;  %3192 = vmatpush.bf16.msra.mxu3 %v2860_v24  ;;  %2089 = vmatpush.bf16.msrb.mxu0 %v2860_v24 }
 0x4b3   : > { %v1776_v16 = vsub.f32 %v1645_v10, %v1742_v3  ;;  %v1777_v42 = vsub.f32 %v1694_v11, %v1742_v3  ;;  %3190 = vmatpush.bf16.msrb.mxu1 %v2860_v24  ;;  %3191 = vmatpush.bf16.msra.mxu2 %v2860_v24 }
 0x4b5   : > { %v4633_v2 = vpop.eup %3339  ;;  %v1832_v21 = vmul.f32 1.442695, %v1776_v16  ;;  %v1834_v62 = vmul.f32 1.442695, %v1777_v42 }
 0x4b6   : > { %v4635_v29 = vpop.eup %3341 }
 0x4b7   : > { %v1881_v14 = vadd.f32 %v4635_v29, %v4633_v2  ;;  %3343 = vpow2.f32 %v1832_v21 }
 0x4b8   : > { %3345 = vpow2.f32 %v1834_v62 }
 0x4b9   : > { %1882 = vadd.xlane.f32.xlu0 %v1881_v14  ;;  %1714 = vmax.xlane.f32.xlu2 %v1713_v60 }
 0x4ba   : > { %v1745_v31 = vpop.xlane.xlu1 %1744 }
 0x4bb   : > { %v1778_v61 = vsub.f32 %v1647_v43, %v1745_v31  ;;  %v1779_v23 = vsub.f32 %v1696_v37, %v1745_v31 }
 0x4bd   : > { %v1836_v12 = vmul.f32 1.442695, %v1778_v61  ;;  %v1838_v8 = vmul.f32 1.442695, %v1779_v23  ;;  %v4641_v25 = vpop.eup %3343 }
 0x4be   : > { %v4645_v10 = vpop.eup %3345 }
 0x4bf   : > { %3347 = vpow2.f32 %v1836_v12  ;;  %v1884_v11 = vadd.f32 %v4645_v10, %v4641_v25 }
 0x4c0   : > { %3349 = vpow2.f32 %v1838_v8  ;;  %v1725_v8 = vmax.f32 %v4603_v56, %v4605_v39 }
 0x4c1   : > { %1717 = vmax.xlane.f32.xlu2 %v1716_v50  ;;  %1885 = vadd.xlane.f32.xlu0 %v1884_v11 }
 0x4c2   : > { %v1709_v30 = vpop.xlane.xlu1 %1708  ;;  %v1748_v28 = vpop.xlane.xlu2 %1747 }
 0x4c3   : > { %v1780_v43 = vsub.f32 %v1650_v17, %v1748_v28  ;;  %v1781_v37 = vsub.f32 %v1699_v33, %v1748_v28  ;;  %v1754_v44 = vsub.f32 %v4579_v20, %v1709_v30  ;;  %v1755_v58 = vsub.f32 %v4581_v22, %v1709_v30  ;;  %v1706_v33 = vpop.xlane.xlu0 %1705 }
 0x4c4   : > { %v1752_v22 = vsub.f32 %v4575_v59, %v1706_v33  ;;  %v1753_v42 = vsub.f32 %v4577_v19, %v1706_v33  ;;  %v1722_v59 = vmax.f32 %v4599_v45, %v4601_v15  ;;  %v2854_v33 = vld [vmem:[#allocation4 + $0x28] sm:$0xff] }
 0x4c5   : > { %v4649_v48 = vpop.eup %3347  ;;  %v1840_v5 = vmul.f32 1.442695, %v1780_v43  ;;  %v1842_v6 = vmul.f32 1.442695, %v1781_v37  ;;  %v1788_v27 = vmul.f32 1.442695, %v1754_v44  ;;  %v1731_v44 = vmax.f32 %v4611_v51, %v4613_v41 }
 0x4c6   : > { %v4651_v36 = vpop.eup %3349  ;;  %v1790_v20 = vmul.f32 1.442695, %v1755_v58  ;;  %v1784_v62 = vmul.f32 1.442695, %v1752_v22  ;;  %v1786_v19 = vmul.f32 1.442695, %v1753_v42 }
 0x4c7   : > { %v1887_v49 = vadd.f32 %v4651_v36, %v4649_v48  ;;  %3351 = vpow2.f32 %v1840_v5  ;;  %v1728_v5 = vmax.f32 %v4607_v9, %v4609_v35  ;;  %v2857_v58 = vld [vmem:[#allocation4 + $0x40] sm:$0xff] }
 0x4c8   : > { %3353 = vpow2.f32 %v1842_v6 }
 0x4c9   : > { %1888 = vadd.xlane.f32.xlu1 %v1887_v49  ;;  %1720 = vmax.xlane.f32.xlu0 %v1719_v32  ;;  %3355 = vpow2.f32 %v1788_v27  ;;  %v2858_v49 = vld [vmem:[#allocation4 + $0x48] sm:$0xff]  ;;  %v2856_v32 = vld [vmem:[#allocation4 + $0x10] sm:$0xff] }
 0x4ca   : > { %v1751_v17 = vpop.xlane.xlu2 %1750  ;;  %v1712_v53 = vpop.xlane.xlu1 %1711  ;;  %3357 = vpow2.f32 %v1790_v20 }
 0x4cb   : > { %v1782_v7 = vsub.f32 %v4619_v54, %v1751_v17  ;;  %v1783_v63 = vsub.f32 %v4621_v40, %v1751_v17  ;;  %v1756_v16 = vsub.f32 %v4583_v34, %v1712_v53  ;;  %v1757_v40 = vsub.f32 %v4585_v1, %v1712_v53  ;;  %v2859_v34 = vld [vmem:[#allocation4 + $0x30] sm:$0xff]  ;;  %v2855_v17 = vld [vmem:[#allocation4 + $0x68] sm:$0xff] }
 0x4cc   : > { %3195 = vmatpush.bf16.msra.mxu3 %v2859_v34  ;;  %2090 = vmatpush.bf16.msrb.mxu0 %v2859_v34 }
 0x4cd   : > { %v1844_v13 = vmul.f32 1.442695, %v1782_v7  ;;  %v1846_v18 = vmul.f32 1.442695, %v1783_v63  ;;  %v4662_v3 = vpop.eup %3351  ;;  %v1792_v14 = vmul.f32 1.442695, %v1756_v16  ;;  %3193 = vmatpush.bf16.msrb.mxu1 %v2859_v34  ;;  %3194 = vmatpush.bf16.msra.mxu2 %v2859_v34 }
 0x4ce   : > { %v4665_v54 = vpop.eup %3353  ;;  %v1794_v60 = vmul.f32 1.442695, %v1757_v40  ;;  %v2869_v7 = vld [vmem:[#allocation4 + $0x50] sm:$0xff]  ;;  %v2867_v16 = vld [vmem:[#allocation4 + $0x8] sm:$0xff] }
 0x4cf   : > { %3359 = vpow2.f32 %v1844_v13  ;;  %v1890_v21 = vadd.f32 %v4665_v54, %v4662_v3  ;;  %v4673_v1 = vpop.eup %3355  ;;  %v2868_v13 = vld [vmem:[#allocation4 + $0x60] sm:$0xff] }
 0x4d0   : > { %3361 = vpow2.f32 %v1846_v18  ;;  %v4675_v31 = vpop.eup %3357  ;;  %3198 = vmatpush.bf16.msra.mxu3 %v2858_v49  ;;  %2091 = vmatpush.bf16.msrb.mxu0 %v2858_v49 }
 0x4d1   : > { %1723 = vmax.xlane.f32.xlu0 %v1722_v59  ;;  %1891 = vadd.xlane.f32.xlu1 %v1890_v21  ;;  %3363 = vpow2.f32 %v1784_v62  ;;  %v1851_v12 = vadd.f32 %v4675_v31, %v4673_v1 }
 0x4d2   : > { %3365 = vpow2.f32 %v1792_v14  ;;  %3196 = vmatpush.bf16.msrb.mxu1 %v2858_v49  ;;  %3197 = vmatpush.bf16.msra.mxu2 %v2858_v49  ;;  %v2864_v49 = vld [vmem:[#allocation4 + $0x18] sm:$0xff] }
 0x4d3   : > { %3367 = vpow2.f32 %v1794_v60 }
 0x4d4   : > { %3369 = vpow2.f32 %v1786_v19  ;;  %3201 = vmatpush.bf16.msra.mxu3 %v2857_v58  ;;  %2092 = vmatpush.bf16.msrb.mxu0 %v2857_v58  ;;  %v2866_v19 = vld [vmem:[#allocation4] sm:$0xff] }
 0x4d5   : > { %v4677_v61 = vpop.eup %3359 }
 0x4d6   : > { %v4679_v23 = vpop.eup %3361  ;;  %3199 = vmatpush.bf16.msrb.mxu1 %v2857_v58  ;;  %3200 = vmatpush.bf16.msra.mxu2 %v2857_v58 }
 0x4d7   : > { %v1893_v50 = vadd.f32 %v4679_v23, %v4677_v61  ;;  %v4687_v11 = vpop.eup %3363 }
 0x4d8   : > { %v4689_v30 = vpop.eup %3365  ;;  %3204 = vmatpush.bf16.msra.mxu3 %v2856_v32  ;;  %2093 = vmatpush.bf16.msrb.mxu0 %v2856_v32 }
 0x4d9   : > { %1852 = vadd.xlane.f32.xlu0 %v1851_v12  ;;  %1726 = vmax.xlane.f32.xlu1 %v1725_v8  ;;  %v4691_v28 = vpop.eup %3367 }
 0x4da   : > { %1894 = vadd.xlane.f32.xlu2 %v1893_v50  ;;  %v4693_v43 = vpop.eup %3369  ;;  %v1854_v37 = vadd.f32 %v4691_v28, %v4689_v30  ;;  %3202 = vmatpush.bf16.msrb.mxu1 %v2856_v32 }
 0x4db   : > { %v1848_v6 = vadd.f32 %v4693_v43, %v4687_v11  ;;  %3203 = vmatpush.bf16.msra.mxu2 %v2856_v32 }
 0x4dc   : > { %3207 = vmatpush.bf16.msra.mxu3 %v2855_v17  ;;  %2094 = vmatpush.bf16.msrb.mxu0 %v2855_v17 }
 0x4de   : > { %3205 = vmatpush.bf16.msrb.mxu1 %v2855_v17 }
 0x4df   : > { %3206 = vmatpush.bf16.msra.mxu2 %v2855_v17 }
 0x4e0   : > { %3210 = vmatpush.bf16.msra.mxu3 %v2854_v33  ;;  %2095 = vmatpush.bf16.msrb.mxu0 %v2854_v33 }
 0x4e1   : > { %1855 = vadd.xlane.f32.xlu0 %v1854_v37  ;;  %1729 = vmax.xlane.f32.xlu1 %v1728_v5 }
 0x4e2   : > { %1849 = vadd.xlane.f32.xlu2 %v1848_v6  ;;  %3208 = vmatpush.bf16.msrb.mxu1 %v2854_v33 }
 0x4e3   : > { %3209 = vmatpush.bf16.msra.mxu2 %v2854_v33 }
 0x4e4   : > { %2137 = vmatpush.bf16.msrb.mxu3 %v2869_v7 }
 0x4e8   : > { %2138 = vmatpush.bf16.msrb.mxu3 %v2868_v13 }
 0x4ea   : > { %1732 = vmax.xlane.f32.xlu2 %v1731_v44 }
 0x4ec   : > { %2139 = vmatpush.bf16.msrb.mxu3 %v2867_v16 }
 0x4f0   : > { %2140 = vmatpush.bf16.msrb.mxu3 %v2866_v19 }
 0x524   : > { %v1880_v27 = vpop.xlane.xlu2 %1879 }
 0x525   : > { %3371 = vrcp.f32 %v1880_v27 }
 0x52b   : > { %v3372_v24 = vpop.eup %3371 }
 0x52c   : > { %v1883_v63 = vpop.xlane.xlu0 %1882  ;;  %v1715_v20 = vpop.xlane.xlu2 %1714  ;;  %v1932_v59 = vmul.f32 %v3372_v24, %v4627_v4  ;;  %v4708_v62 = vmul.f32 %v3372_v24, %v4629_v52 }
 0x52d   : > { %3373 = vrcp.f32 %v1883_v63  ;;  %v1758_v53 = vsub.f32 %v4587_v38, %v1715_v20  ;;  %v1759_v26 = vsub.f32 %v4589_v47, %v1715_v20  ;;  %v2863_v63 = vld [vmem:[#allocation4 + $0x78] sm:$0xff] }
 0x52f   : > { %v1796_v22 = vmul.f32 1.442695, %v1758_v53  ;;  %v1798_v18 = vmul.f32 1.442695, %v1759_v26  ;;  %v2862_v53 = vld [vmem:[#allocation4 + $0x20] sm:$0xff] }
 0x531   : > { %3375 = vpow2.f32 %v1796_v22 }
 0x532   : > { %3377 = vpow2.f32 %v1798_v18 }
 0x533   : > { %v3374_v40 = vpop.eup %3373 }
 0x534   : > { %v1718_v42 = vpop.xlane.xlu2 %1717  ;;  %v1934_v21 = vmul.f32 %v3374_v40, %v4633_v2  ;;  %v4711_v38 = vmul.f32 %v3374_v40, %v4635_v29  ;;  %v1886_v14 = vpop.xlane.xlu0 %1885 }
 0x535   : > { %v1760_v47 = vsub.f32 %v4591_v57, %v1718_v42  ;;  %v1761_v34 = vsub.f32 %v4593_v46, %v1718_v42  ;;  %3379 = vrcp.f32 %v1886_v14  ;;  %v2865_v46 = vld [vmem:[#allocation4 + $0x58] sm:$0xff] }
 0x536   : > { %v1954_v60 = vpack.c.bf16 %v1934_v21, %v1932_v59  ;;  %v1955_v12 = vpack.c.bf16 %v4711_v38, %v4708_v62  ;;  %2141 = vmatpush.bf16.msrb.mxu3 %v2865_v46 }
 0x537   : > { %v4717_v4 = vpop.eup %3375  ;;  %v1800_v2 = vmul.f32 1.442695, %v1760_v47  ;;  %v1802_v8 = vmul.f32 1.442695, %v1761_v34 }
 0x538   : > { %v4719_v50 = vpop.eup %3377  ;;  %2121 = vmatmul.bf16.vlgmr.msra.gmra.mxu3 %v1954_v60 }
 0x539   : > { %3381 = vpow2.f32 %v1800_v2  ;;  %v1857_v57 = vadd.f32 %v4719_v50, %v4717_v4 }
 0x53a   : > { %3383 = vpow2.f32 %v1802_v8  ;;  %2142 = vmatpush.bf16.msrb.mxu3 %v2864_v49 }
 0x53b   : > { %1858 = vadd.xlane.f32.xlu1 %v1857_v57  ;;  %v3380_v29 = vpop.eup %3379 }
 0x53c   : > { %v1889_v52 = vpop.xlane.xlu1 %1888  ;;  %v1721_v37 = vpop.xlane.xlu0 %1720  ;;  %v1936_v7 = vmul.f32 %v3380_v29, %v4641_v25 }
 0x53d   : > { %3385 = vrcp.f32 %v1889_v52  ;;  %v1762_v6 = vsub.f32 %v4595_v55, %v1721_v37  ;;  %v1763_v44 = vsub.f32 %v4597_v0, %v1721_v37  ;;  %v4734_v0 = vmul.f32 %v3380_v29, %v4645_v10 }
 0x53e   : > { %2143 = vmatpush.bf16.msrb.mxu3 %v2863_v63 }
 0x53f   : > { %v4723_v5 = vpop.eup %3381  ;;  %v1804_v32 = vmul.f32 1.442695, %v1762_v6  ;;  %v1806_v17 = vmul.f32 1.442695, %v1763_v44 }
 0x540   : > { %v4727_v58 = vpop.eup %3383 }
 0x541   : > { %v1860_v33 = vadd.f32 %v4727_v58, %v4723_v5  ;;  %3387 = vpow2.f32 %v1804_v32 }
 0x542   : > { %3389 = vpow2.f32 %v1806_v17  ;;  %2144 = vmatpush.bf16.msrb.mxu3 %v2862_v53 }
 0x543   : > { %v3386_v27 = vpop.eup %3385  ;;  %1861 = vadd.xlane.f32.xlu2 %v1860_v33 }
 0x544   : > { %v1938_v55 = vmul.f32 %v3386_v27, %v4649_v48  ;;  %v4737_v20 = vmul.f32 %v3386_v27, %v4651_v36  ;;  %v1724_v26 = vpop.xlane.xlu0 %1723  ;;  %v1892_v13 = vpop.xlane.xlu1 %1891 }
 0x545   : > { %v1764_v25 = vsub.f32 %v4599_v45, %v1724_v26  ;;  %v1765_v24 = vsub.f32 %v4601_v15, %v1724_v26 }
 0x546   : > { %v1956_v22 = vpack.c.bf16 %v1938_v55, %v1936_v7  ;;  %v1957_v18 = vpack.c.bf16 %v4737_v20, %v4734_v0 }
 0x547   : > { %v4743_v48 = vpop.eup %3387  ;;  %v1808_v10 = vmul.f32 1.442695, %v1764_v25  ;;  %v1810_v16 = vmul.f32 1.442695, %v1765_v24 }
 0x548   : > { %2126 = vmatmul.bf16.gmra.mxu3 %v1956_v22  ;;  %v4745_v36 = vpop.eup %3389 }
 0x549   : > { %3391 = vpow2.f32 %v1808_v10  ;;  %v1863_v40 = vadd.f32 %v4745_v36, %v4743_v48 }
 0x54a   : > { %3393 = vpow2.f32 %v1810_v16 }
 0x54b   : > { %1864 = vadd.xlane.f32.xlu0 %v1863_v40  ;;  %3395 = vrcp.f32 %v1892_v13 }
 0x54c   : > { %v1727_v42 = vpop.xlane.xlu1 %1726  ;;  %v1853_v60 = vpop.xlane.xlu0 %1852 }
 0x54d   : > { %v1766_v45 = vsub.f32 %v4603_v56, %v1727_v42  ;;  %v1767_v15 = vsub.f32 %v4605_v39, %v1727_v42  ;;  %v1895_v59 = vpop.xlane.xlu2 %1894 }
 0x54e   : > { %3397 = vrcp.f32 %v1895_v59 }
 0x54f   : > { %v4751_v21 = vpop.eup %3391  ;;  %v1812_v47 = vmul.f32 1.442695, %v1766_v45  ;;  %v1814_v34 = vmul.f32 1.442695, %v1767_v15 }
 0x550   : > { %v4753_v14 = vpop.eup %3393 }
 0x551   : > { %3399 = vpow2.f32 %v1812_v47  ;;  %v1866_v19 = vadd.f32 %v4753_v14, %v4751_v21  ;;  %v3396_v2 = vpop.eup %3395 }
 0x552   : > { %3401 = vpow2.f32 %v1814_v34  ;;  %v1940_v52 = vmul.f32 %v3396_v2, %v4662_v3  ;;  %v4762_v37 = vmul.f32 %v3396_v2, %v4665_v54  ;;  %v2877_v2 = vld [vmem:[%s5013_s20 + $0x38] sm:$0xff] }
 0x553   : > { %1867 = vadd.xlane.f32.xlu1 %v1866_v19  ;;  %3403 = vrcp.f32 %v1853_v60  ;;  %2262 = vmatpush.bf16.msrb.mxu2 %v2877_v2 }
 0x554   : > { %v3398_v8 = vpop.eup %3397  ;;  %v1730_v56 = vpop.xlane.xlu1 %1729 }
 0x555   : > { %v1768_v39 = vsub.f32 %v4607_v9, %v1730_v56  ;;  %v1769_v57 = vsub.f32 %v4609_v35, %v1730_v56  ;;  %v1850_v46 = vpop.xlane.xlu2 %1849  ;;  %v1942_v29 = vmul.f32 %v3398_v8, %v4677_v61  ;;  %v4765_v6 = vmul.f32 %v3398_v8, %v4679_v23  ;;  %v1856_v16 = vpop.xlane.xlu0 %1855 }
 0x556   : > { %3405 = vrcp.f32 %v1850_v46 }
 0x557   : > { %v4767_v44 = vpop.eup %3399  ;;  %v1816_v49 = vmul.f32 1.442695, %v1768_v39  ;;  %v1818_v32 = vmul.f32 1.442695, %v1769_v57  ;;  %v1958_v17 = vpack.c.bf16 %v1942_v29, %v1940_v52  ;;  %v1959_v35 = vpack.c.bf16 %v4765_v6, %v4762_v37  ;;  %v2874_v29 = vld [vmem:[%s5013_s20 + $0x20] sm:$0xff] }
 0x558   : > { %v4769_v9 = vpop.eup %3401 }
 0x559   : > { %3407 = vpow2.f32 %v1816_v49  ;;  %2131 = vmatmul.bf16.gmra.mxu3 %v1958_v17  ;;  %v1869_v3 = vadd.f32 %v4769_v9, %v4767_v44  ;;  %v3404_v54 = vpop.eup %3403 }
 0x55a   : > { %3409 = vpow2.f32 %v1818_v32  ;;  %v1914_v27 = vmul.f32 %v3404_v54, %v4673_v1 }
 0x55b   : > { %1870 = vadd.xlane.f32.xlu2 %v1869_v3 }
 0x55c   : > { %v3406_v61 = vpop.eup %3405 }
 0x55d   : > { %v1733_v23 = vpop.xlane.xlu2 %1732  ;;  %v1912_v33 = vmul.f32 %v3406_v61, %v4687_v11  ;;  %v1913_v1 = vmul.f32 %v3406_v61, %v4693_v43 }
 0x55e   : > { %v1770_v7 = vsub.f32 %v4611_v51, %v1733_v23  ;;  %v1771_v63 = vsub.f32 %v4613_v41, %v1733_v23  ;;  %v1915_v51 = vmul.f32 %v3404_v54, %v4675_v31 }
 0x55f   : > { %v4779_v55 = vpop.eup %3407  ;;  %v1944_v53 = vpack.c.bf16 %v1914_v27, %v1912_v33 }
 0x560   : > { %v4781_v26 = vpop.eup %3409  ;;  %v1820_v13 = vmul.f32 1.442695, %v1770_v7  ;;  %v1822_v22 = vmul.f32 1.442695, %v1771_v63  ;;  %v1945_v11 = vpack.c.bf16 %v1915_v51, %v1913_v1 }
 0x561   : > { %2096 = vmatmul.bf16.vlgmr.msrb.gmra.mxu0 %v1944_v53  ;;  %v1872_v25 = vadd.f32 %v4781_v26, %v4779_v55  ;;  %v2870_v53 = vld [vmem:[%s5013_s20] sm:$0xff] }
 0x562   : > { %3411 = vpow2.f32 %v1820_v13 }
 0x563   : > { %3413 = vpow2.f32 %v1822_v22  ;;  %1873 = vadd.xlane.f32.xlu0 %v1872_v25 }
 0x564   : > { %3415 = vrcp.f32 %v1856_v16 }
 0x568   : > { %v4787_v41 = vpop.eup %3411 }
 0x569   : > { %v4789_v24 = vpop.eup %3413  ;;  %2145 = vmatmul.bf16.vlgmr.msrb.gmra.mxu3 %v1945_v11 }
 0x56a   : > { %v1875_v10 = vadd.f32 %v4789_v24, %v4787_v41  ;;  %v3416_v42 = vpop.eup %3415 }
 0x56b   : > { %v1916_v43 = vmul.f32 %v3416_v42, %v4689_v30  ;;  %v1917_v15 = vmul.f32 %v3416_v42, %v4691_v28  ;;  %v2876_v28 = vld [vmem:[%s5013_s20 + $0x30] sm:$0xff] }
 0x56c   : > { %1876 = vadd.xlane.f32.xlu1 %v1875_v10  ;;  %2263 = vmatpush.bf16.msrb.mxu2 %v2876_v28 }
 0x5ae   : > { %v1859_v40 = vpop.xlane.xlu1 %1858 }
 0x5af   : > { %3417 = vrcp.f32 %v1859_v40 }
 0x5b5   : > { %v3418_v45 = vpop.eup %3417 }
 0x5b6   : > { %v1918_v31 = vmul.f32 %v3418_v45, %v4717_v4  ;;  %v1919_v59 = vmul.f32 %v3418_v45, %v4719_v50  ;;  %v1862_v19 = vpop.xlane.xlu2 %1861  ;;  %v2875_v4 = vld [vmem:[%s5013_s20 + $0x28] sm:$0xff] }
 0x5b7   : > { %3419 = vrcp.f32 %v1862_v19  ;;  %2264 = vmatpush.bf16.msrb.mxu2 %v2875_v4 }
 0x5b8   : > { %v1946_v47 = vpack.c.bf16 %v1918_v31, %v1916_v43  ;;  %v1947_v34 = vpack.c.bf16 %v1919_v59, %v1917_v15 }
 0x5ba   : > { %2101 = vmatmul.bf16.vlgmr.msrb.gmra.mxu1 %v1946_v47  ;;  %2150 = vmatmul.bf16.gmra.mxu3 %v1947_v34 }
 0x5bb   : > { %v4797_v60 = vpop.f32.mrf.mxu3  ;;  %2265 = vmatpush.bf16.msrb.mxu2 %v2874_v29 }
 0x5bd   : > { %v3420_v8 = vpop.eup %3419 }
 0x5be   : > { %v1865_v30 = vpop.xlane.xlu0 %1864  ;;  %v1920_v39 = vmul.f32 %v3420_v8, %v4723_v5  ;;  %v1921_v46 = vmul.f32 %v3420_v8, %v4727_v58  ;;  %v2873_v5 = vld [vmem:[%s5013_s20 + $0x18] sm:$0xff]  ;;  %v2872_v58 = vld [vmem:[%s5013_s20 + $0x10] sm:$0xff] }
 0x5bf   : > { %3421 = vrcp.f32 %v1865_v30  ;;  %2266 = vmatpush.bf16.msrb.mxu2 %v2873_v5  ;;  %v4857_v5 = vld [vmem:[%s5014_s22] ss:$0 sm:$0xff] }
 0x5c3   : > { %v4808_v50 = vpop.f32.mrf.mxu3  ;;  %2267 = vmatpush.bf16.msrb.mxu2 %v2872_v58 }
 0x5c5   : > { %v3422_v56 = vpop.eup %3421 }
 0x5c6   : > { %v1922_v57 = vmul.f32 %v3422_v56, %v4743_v48  ;;  %v1923_v52 = vmul.f32 %v3422_v56, %v4745_v36  ;;  %v1868_v3 = vpop.xlane.xlu1 %1867  ;;  %v2871_v36 = vld [vmem:[%s5013_s20 + $0x8] sm:$0xff] }
 0x5c7   : > { %3423 = vrcp.f32 %v1868_v3  ;;  %2268 = vmatpush.bf16.msrb.mxu2 %v2871_v36  ;;  %v2312_v36 = vld [vmem:[%s4862_s18] sm:$0xff] }
 0x5c8   : > { %v1948_v49 = vpack.c.bf16 %v1922_v57, %v1920_v39  ;;  %v1949_v32 = vpack.c.bf16 %v1923_v52, %v1921_v46 }
 0x5ca   : > { %2106 = vmatmul.bf16.vlgmr.msra.gmra.mxu2 %v1948_v49  ;;  %2155 = vmatmul.bf16.gmra.mxu3 %v1949_v32 }
 0x5cb   : > { %v4817_v17 = vpop.f32.mrf.mxu3  ;;  %2269 = vmatpush.bf16.msrb.mxu2 %v2870_v53 }
 0x5cd   : > { %v3424_v61 = vpop.eup %3423 }
 0x5ce   : > { %v1871_v48 = vpop.xlane.xlu2 %1870  ;;  %v1924_v33 = vmul.f32 %v3424_v61, %v4751_v21  ;;  %v1925_v7 = vmul.f32 %v3424_v61, %v4753_v14 }
 0x5cf   : > { %3425 = vrcp.f32 %v1871_v48 }
 0x5d3   : > { %v4828_v54 = vpop.f32.mrf.mxu3 }
 0x5d5   : > { %v3426_v23 = vpop.eup %3425 }
 0x5d6   : > { %v1926_v27 = vmul.f32 %v3426_v23, %v4767_v44  ;;  %v1927_v63 = vmul.f32 %v3426_v23, %v4769_v9  ;;  %v1874_v25 = vpop.xlane.xlu0 %1873 }
 0x5d7   : > { %3427 = vrcp.f32 %v1874_v25 }
 0x5d8   : > { %v1950_v13 = vpack.c.bf16 %v1926_v27, %v1924_v33  ;;  %v1951_v22 = vpack.c.bf16 %v1927_v63, %v1925_v7  ;;  %v2313_v7 = vld [vmem:[%s4862_s18 + $0x8] sm:$0xff] }
 0x5da   : > { %2111 = vmatmul.bf16.gmra.mxu2 %v1950_v13  ;;  %2160 = vmatmul.bf16.gmra.mxu3 %v1951_v22 }
 0x5dc   : > { %v4837_v1 = vpop.f32.mrf.mxu3 }
 0x5dd   : > { %v3428_v44 = vpop.eup %3427 }
 0x5de   : > { %v1928_v9 = vmul.f32 %v3428_v44, %v4779_v55  ;;  %v1929_v10 = vmul.f32 %v3428_v44, %v4781_v26  ;;  %v2097_v45 = vpop.f32.mrf.mxu0 }
 0x5df   : > { %v1877_v21 = vpop.xlane.xlu1 %1876 }
 0x5e0   : > { %3429 = vrcp.f32 %v1877_v21 }
 0x5e4   : > { %v4839_v51 = vpop.f32.mrf.mxu3 }
 0x5e6   : > { %v3430_v14 = vpop.eup %3429  ;;  %v2099_v31 = vpop.f32.mrf.mxu0 }
 0x5e7   : > { %v1930_v11 = vmul.f32 %v3430_v14, %v4787_v41  ;;  %v1931_v16 = vmul.f32 %v3430_v14, %v4789_v24 }
 0x5e9   : > { %v1952_v40 = vpack.c.bf16 %v1930_v11, %v1928_v9  ;;  %v1953_v42 = vpack.c.bf16 %v1931_v16, %v1929_v10 }
 0x5eb   : > { %2116 = vmatmul.bf16.gmra.mxu2 %v1952_v40  ;;  %2165 = vmatmul.bf16.gmra.mxu3 %v1953_v42 }
 0x5ec   : > { %v2146_v43 = vpop.f32.mrf.mxu3 }
 0x5ed   : > { %v2147_v59 = vadd.f32 %v2146_v43, %v2097_v45  ;;  %v2314_v45 = vld [vmem:[%s4862_s18 + $0x10] sm:$0xff] }
 0x5f4   : > { %v2148_v15 = vpop.f32.mrf.mxu3 }
 0x5f5   : > { %v2149_v47 = vadd.f32 %v2148_v15, %v2099_v31  ;;  %v2315_v31 = vld [vmem:[%s4862_s18 + $0x18] sm:$0xff] }
 0x5f7   : > { %v2186_v34 = vpack.c.bf16 %v2149_v47, %v2147_v59 }
 0x5fb   : > { %2170 = vmatmul.bf16.gmra.mxu3 %v1955_v12  ;;  %2270 = vmatmul.bf16.vlgmr.msrb.gmra.mxu2 %v2186_v34 }
 0x60b   : > { %2175 = vmatmul.bf16.gmra.mxu3 %v1957_v18 }
 0x61b   : > { %2180 = vmatmul.bf16.gmra.mxu3 %v1959_v35 }
 0x637   : > { %v2102_v55 = vpop.f32.mrf.mxu1 }
 0x63d   : > { %v2151_v26 = vpop.f32.mrf.mxu3 }
 0x63e   : > { %v2152_v19 = vadd.f32 %v2151_v26, %v2102_v55  ;;  %v2317_v26 = vld [vmem:[%s4862_s18 + $0x28] sm:$0xff] }
 0x63f   : > { %v2104_v41 = vpop.f32.mrf.mxu1 }
 0x645   : > { %v2153_v24 = vpop.f32.mrf.mxu3 }
 0x646   : > { %v2154_v2 = vadd.f32 %v2153_v24, %v2104_v41 }
 0x648   : > { %v2187_v30 = vpack.c.bf16 %v2154_v2, %v2152_v19  ;;  %v2318_v2 = vld [vmem:[%s4862_s18 + $0x30] sm:$0xff] }
 0x64a   : > { %2275 = vmatmul.bf16.gmra.mxu2 %v2187_v30 }
 0x64d   : > { %v2107_v28 = vpop.f32.mrf.mxu2  ;;  %v2156_v62 = vpop.f32.mrf.mxu3 }
 0x64e   : > { %v2157_v4 = vadd.f32 %v2156_v62, %v2107_v28 }
 0x655   : > { %v2109_v38 = vpop.f32.mrf.mxu2  ;;  %v2158_v12 = vpop.f32.mrf.mxu3 }
 0x656   : > { %v2159_v8 = vadd.f32 %v2158_v12, %v2109_v38  ;;  %v2319_v38 = vld [vmem:[%s4862_s18 + $0x38] sm:$0xff] }
 0x658   : > { %v2188_v0 = vpack.c.bf16 %v2159_v8, %v2157_v4 }
 0x65a   : > { %2280 = vmatmul.bf16.gmra.mxu2 %v2188_v0  ;;  %v2320_v0 = vld [vmem:[%s4862_s18 + $0x40] sm:$0xff] }
 0x65d   : > { %v2112_v20 = vpop.f32.mrf.mxu2  ;;  %v2161_v18 = vpop.f32.mrf.mxu3 }
 0x65e   : > { %v2162_v35 = vadd.f32 %v2161_v18, %v2112_v20 }
 0x665   : > { %v2114_v37 = vpop.f32.mrf.mxu2  ;;  %v2163_v6 = vpop.f32.mrf.mxu3 }
 0x666   : > { %v2164_v56 = vadd.f32 %v2163_v6, %v2114_v37  ;;  %v2321_v6 = vld [vmem:[%s4862_s18 + $0x48] sm:$0xff] }
 0x668   : > { %v2189_v39 = vpack.c.bf16 %v2164_v56, %v2162_v35 }
 0x66a   : > { %2285 = vmatmul.bf16.gmra.mxu2 %v2189_v39 }
 0x66e   : > { %v2117_v57 = vpop.f32.mrf.mxu2  ;;  %v2166_v46 = vpop.f32.mrf.mxu3 }
 0x66f   : > { %v2167_v49 = vadd.f32 %v2166_v46, %v2117_v57  ;;  %v2322_v57 = vld [vmem:[%s4862_s18 + $0x50] sm:$0xff] }
 0x676   : > { %v2119_v52 = vpop.f32.mrf.mxu2  ;;  %v2168_v29 = vpop.f32.mrf.mxu3 }
 0x677   : > { %v2169_v32 = vadd.f32 %v2168_v29, %v2119_v52 }
 0x679   : > { %v2190_v3 = vpack.c.bf16 %v2169_v32, %v2167_v49  ;;  %v2323_v49 = vld [vmem:[%s4862_s18 + $0x58] sm:$0xff] }
 0x67b   : > { %2290 = vmatmul.bf16.gmra.mxu2 %v2190_v3 }
 0x67e   : > { %v2171_v58 = vpop.f32.mrf.mxu3  ;;  %v2271_v48 = vpop.f32.mrf.mxu2 }
 0x67f   : > { %v2272_v61 = vadd.f32 %v4857_v5, %v2271_v48  ;;  %v2172_v63 = vadd.f32 %v2171_v58, %v4797_v60  ;;  %v2324_v48 = vld [vmem:[%s4862_s18 + $0x60] sm:$0xff] }
 0x681   : > { %v2328_v23 = vadd.f32 %v2312_v36, %v2272_v61 }
 0x683   : > { %2344 = vst [vmem:[%s3814_s6] sm:$0xff] %v2328_v23 }
 0x686   : > { %v2173_v33 = vpop.f32.mrf.mxu3  ;;  %v2273_v27 = vpop.f32.mrf.mxu2 }
 0x687   : > { %v2174_v53 = vadd.f32 %v2173_v33, %v4808_v50  ;;  %v2274_v13 = vadd.f32 %v4857_v5, %v2273_v27  ;;  %v2325_v33 = vld [vmem:[%s4862_s18 + $0x68] sm:$0xff] }
 0x689   : > { %v2329_v22 = vadd.f32 %v2313_v7, %v2274_v13  ;;  %v2191_v25 = vpack.c.bf16 %v2174_v53, %v2172_v63  ;;  %v2326_v53 = vld [vmem:[%s4862_s18 + $0x70] sm:$0xff] }
 0x68b   : > { %2345 = vst [vmem:[%s3814_s6 + $0x8] sm:$0xff] %v2329_v22  ;;  %2295 = vmatmul.bf16.gmra.mxu2 %v2191_v25 }
 0x68e   : > { %v2176_v21 = vpop.f32.mrf.mxu3 }
 0x68f   : > { %v2177_v14 = vadd.f32 %v2176_v21, %v4817_v17  ;;  %v2327_v21 = vld [vmem:[%s4862_s18 + $0x78] sm:$0xff] }
 0x696   : > { %v2178_v44 = vpop.f32.mrf.mxu3 }
 0x697   : > { %v2179_v9 = vadd.f32 %v2178_v44, %v4828_v54 }
 0x699   : > { %v2192_v11 = vpack.c.bf16 %v2179_v9, %v2177_v14 }
 0x69b   : > { %2300 = vmatmul.bf16.gmra.mxu2 %v2192_v11 }
 0x69e   : > { %v2181_v60 = vpop.f32.mrf.mxu3 }
 0x69f   : > { %v2182_v10 = vadd.f32 %v2181_v60, %v4837_v1 }
 0x6a6   : > { %v2183_v50 = vpop.f32.mrf.mxu3 }
 0x6a7   : > { %v2184_v16 = vadd.f32 %v2183_v50, %v4839_v51  ;;  %v2316_v51 = vld [vmem:[%s4862_s18 + $0x20] sm:$0xff] }
 0x6a9   : > { %v2193_v40 = vpack.c.bf16 %v2184_v16, %v2182_v10 }
 0x6ab   : > { %2305 = vmatmul.bf16.gmra.mxu2 %v2193_v40 }
 0x6cd   : > { %v2276_v42 = vpop.f32.mrf.mxu2 }
 0x6ce   : > { %v2277_v17 = vadd.f32 %v4857_v5, %v2276_v42 }
 0x6d0   : > { %v2330_v43 = vadd.f32 %v2314_v45, %v2277_v17 }
 0x6d2   : > { %2346 = vst [vmem:[%s3814_s6 + $0x10] sm:$0xff] %v2330_v43 }
 0x6d5   : > { %v2278_v54 = vpop.f32.mrf.mxu2 }
 0x6d6   : > { %v2279_v15 = vadd.f32 %v4857_v5, %v2278_v54 }
 0x6d8   : > { %v2331_v59 = vadd.f32 %v2315_v31, %v2279_v15 }
 0x6da   : > { %2347 = vst [vmem:[%s3814_s6 + $0x18] sm:$0xff] %v2331_v59 }
 0x6dd   : > { %v2281_v1 = vpop.f32.mrf.mxu2 }
 0x6de   : > { %v2282_v47 = vadd.f32 %v4857_v5, %v2281_v1 }
 0x6e0   : > { %v2332_v34 = vadd.f32 %v2316_v51, %v2282_v47 }
 0x6e2   : > { %2348 = vst [vmem:[%s3814_s6 + $0x20] sm:$0xff] %v2332_v34 }
 0x6e5   : > { %v2283_v55 = vpop.f32.mrf.mxu2 }
 0x6e6   : > { %v2284_v41 = vadd.f32 %v4857_v5, %v2283_v55 }
 0x6e8   : > { %v2333_v24 = vadd.f32 %v2317_v26, %v2284_v41 }
 0x6ea   : > { %2349 = vst [vmem:[%s3814_s6 + $0x28] sm:$0xff] %v2333_v24 }
 0x6ed   : > { %v2286_v19 = vpop.f32.mrf.mxu2 }
 0x6ee   : > { %v2287_v30 = vadd.f32 %v4857_v5, %v2286_v19 }
 0x6f0   : > { %v2334_v28 = vadd.f32 %v2318_v2, %v2287_v30 }
 0x6f2   : > { %2350 = vst [vmem:[%s3814_s6 + $0x30] sm:$0xff] %v2334_v28 }
 0x6f5   : > { %v2288_v62 = vpop.f32.mrf.mxu2 }
 0x6f6   : > { %v2289_v12 = vadd.f32 %v4857_v5, %v2288_v62 }
 0x6f8   : > { %v2335_v4 = vadd.f32 %v2319_v38, %v2289_v12 }
 0x6fa   : > { %2351 = vst [vmem:[%s3814_s6 + $0x38] sm:$0xff] %v2335_v4 }
 0x6fe   : > { %v2291_v8 = vpop.f32.mrf.mxu2 }
 0x6ff   : > { %v2292_v20 = vadd.f32 %v4857_v5, %v2291_v8 }
 0x701   : > { %v2336_v18 = vadd.f32 %v2320_v0, %v2292_v20 }
 0x703   : > { %2352 = vst [vmem:[%s3814_s6 + $0x40] sm:$0xff] %v2336_v18 }
 0x706   : > { %v2293_v37 = vpop.f32.mrf.mxu2 }
 0x707   : > { %v2294_v35 = vadd.f32 %v4857_v5, %v2293_v37 }
 0x709   : > { %v2337_v56 = vadd.f32 %v2321_v6, %v2294_v35 }
 0x70b   : > { %2353 = vst [vmem:[%s3814_s6 + $0x48] sm:$0xff] %v2337_v56 }
 0x70e   : > { %v2296_v39 = vpop.f32.mrf.mxu2 }
 0x70f   : > { %v2297_v46 = vadd.f32 %v4857_v5, %v2296_v39 }
 0x711   : > { %v2338_v52 = vadd.f32 %v2322_v57, %v2297_v46 }
 0x713   : > { %2354 = vst [vmem:[%s3814_s6 + $0x50] sm:$0xff] %v2338_v52 }
 0x716   : > { %v2298_v29 = vpop.f32.mrf.mxu2 }
 0x717   : > { %v2299_v32 = vadd.f32 %v4857_v5, %v2298_v29 }
 0x719   : > { %v2339_v3 = vadd.f32 %v2323_v49, %v2299_v32 }
 0x71b   : > { %2355 = vst [vmem:[%s3814_s6 + $0x58] sm:$0xff] %v2339_v3 }
 0x71e   : > { %v2301_v58 = vpop.f32.mrf.mxu2 }
 0x71f   : > { %v2302_v36 = vadd.f32 %v4857_v5, %v2301_v58 }
 0x721   : > { %v2340_v61 = vadd.f32 %v2324_v48, %v2302_v36 }
 0x723   : > { %2356 = vst [vmem:[%s3814_s6 + $0x60] sm:$0xff] %v2340_v61 }
 0x726   : > { %v2303_v23 = vpop.f32.mrf.mxu2 }
 0x727   : > { %v2304_v27 = vadd.f32 %v4857_v5, %v2303_v23 }
 0x729   : > { %v2341_v7 = vadd.f32 %v2325_v33, %v2304_v27 }
 0x72b   : > { %2357 = vst [vmem:[%s3814_s6 + $0x68] sm:$0xff] %v2341_v7 }
 0x72e   : > { %v2306_v63 = vpop.f32.mrf.mxu2 }
 0x72f   : > { %v2307_v13 = vadd.f32 %v4857_v5, %v2306_v63 }
 0x731   : > { %v2342_v22 = vadd.f32 %v2326_v53, %v2307_v13 }
 0x733   : > { %2358 = vst [vmem:[%s3814_s6 + $0x70] sm:$0xff] %v2342_v22 }
 0x736   : > { %v2308_v25 = vpop.f32.mrf.mxu2 }
 0x737   : > { %v2309_v44 = vadd.f32 %v4857_v5, %v2308_v25 }
 0x739   : > { %v2343_v14 = vadd.f32 %v2327_v21, %v2309_v44 }
 0x73b   : > { %2359 = vst [vmem:[%s3814_s6 + $0x78] sm:$0xff] %v2343_v14 }
 0x73c   : > { %3518 = shalt.err (!%p3515_p7)
}
 0x73d   : > { %s3624_s3 = smov 128   ;;  %s3625_s6 = smov 8  }
 0x73e   : > { %3217 = dma.vmem_to_hbm [thread:$0]  (%p3741_p6), %s2376_s4, 2048, %s2378_s13, %s2361_s11, %s3624_s3, %s3624_s3, %s3625_s6  }
 0x73f PF: > { %s5018_s24 = sld [smem:[#allocation14_spill]]  ;;  %p3234_p8 = scmp.ge.s32.totalorder %s3617_s15, 2 }
 0x741   : > { %p3228_p9 = pnand %p3234_p8, %p3747_p10 }
 0x743   : > { %p3229_p12 = pneg %p3228_p9 }
 0x745   : > { %s2392_s25 = sand.u32 1, %s5018_s24  }
 0x746   : > { %s2393_s30 = scalar_lea.sflag [#allocation7], %s2392_s25 }
 0x747   : > { %3572 = dma.done.wait (%p3229_p12), %s2393_s30, 2048  }
 0x748   : > { %3574 = vsyncadd (%p3229_p12), %s2393_s30, 4294965248  ;;  %s25_s15 = sadd.s32 1, %s3617_s15   ;;  %s5020_s11 = sld [smem:[#allocation16_spill]] }
 0x749   : > { %p22_p13 = scmp.ge.s32.totalorder %s25_s15, 6   ;;  %s5021_s13 = sld [smem:[#allocation19_spill]] }
 0x74a   : > { %s5022_s21 = sld [smem:[#allocation20_spill]]  ;;  %s5023_s27 = smov %s3581_s28 }
 0x74b   : > { %s5024_s28 = smov %s3585_s29  ;;  %s5025_s29 = smov %s3789_s12 }
 0x74c   : > { %s5026_s30 = smov %s3593_s9  ;;  %s5027_s9 = smov %s3597_s10 }
 0x74d   : > { %s5028_s10 = smov %s3786_s8  ;;  %s5029_s12 = smov %s3613_s14 }
 0x74e   :  { %24 = sbr.rel (!%p22_p13) target bundleno = 17 (0x11), region = 107 }
 0x750   : > { %s5030_s14 = smov %s5022_s21 }
 0x753   :  { %2399 = vsyncpa [#allocation6], 1 }
 0x754   :  { %2401 = vsyncpa [#allocation6 + $0x1], 1 }
 0x755   :  { %2402 = vsyncpa [#allocation9], 1 }
 0x756   :  { %2403 = vsyncpa [#allocation7], 1 }
 0x757   :  { %2405 = vsyncpa [#allocation7 + $0x1], 1 }

</bundles_post_ra>
